<compile_context>
chip_gen: v7x
topology: tpu7x:2x2x1
jax: 0.10.0
libtpu: 0.0.40
codegen_flags: <defaults>
</compile_context>

<pallas_src>
import functools

import numpy as np
import jax
import jax.numpy as jnp
from jax.experimental import pallas as pl
from jax.experimental.pallas import tpu as pltpu

NOUT1 = 30
NOUT2 = 2
NIN = NOUT1 + NOUT2          # 32
NE = 8                       # ne = dataset.data.edge_attr2.shape[1]
NINP = 21                    # ninp = dataset.num_features (one-hot atom types)
HID = 32
NLAYER = 4

H1_END = NLAYER * 2 * NE     # 64  (stacked fc1_1 outputs across the 4 layers)
H2_END = 2 * H1_END          # 128 (stacked fc1_2 outputs)

_VMEM = pl.BlockSpec(memory_space=pltpu.MemorySpace.VMEM)


@functools.lru_cache(maxsize=None)
def _vmem_budget_and_tm():
    """Per-generation VMEM budget + row tile: v5e/v6e (128 MiB) vs v7x (64 MiB)."""
    cap = 64 * 1024 * 1024
    try:
        cap = int(pltpu.get_tpu_info().vmem_capacity_bytes)
    except Exception:
        pass
    if cap >= 100 * 1024 * 1024:          # v5e / v6e
        return 96 * 1024 * 1024, 512
    return 48 * 1024 * 1024, 256          # v7x


# ----------------------------- Pallas kernels -------------------------------

def _edge_mlp_kernel(ea_ref, w123_ref, w4a_ref, w4b_ref, out_ref):
    """All 4 layers' edge MLPs, densified into 3 lane-wide dots.

    w123: (8, 192) = [W1 for layers 0..3 | W2 for 0..3 | W3 for 0..3]
    w4a/w4b: (64, 32) block-diagonal stacks of the fc1_4 split weights.
    Output: (te, 32) with layer l in lanes [l*8:(l+1)*8].
    """
    a = jnp.dot(ea_ref[...], w123_ref[...], preferred_element_type=jnp.float32)
    h1 = jax.nn.relu(a[:, :H1_END])
    h2 = jax.nn.relu(a[:, H1_END:H2_END]) * jax.nn.relu(a[:, H2_END:])
    out_ref[...] = jax.nn.relu(
        jnp.dot(h1, w4a_ref[...], preferred_element_type=jnp.float32)
        + jnp.dot(h2, w4b_ref[...], preferred_element_type=jnp.float32)
    ).astype(out_ref.dtype)


def edge_mlp_all_layers(ea_pad, w123, w4a_bd, w4b_bd, te):
    e_pad = ea_pad.shape[0]
    grid = (e_pad // te,)
    return pl.pallas_call(
        _edge_mlp_kernel,
        out_shape=jax.ShapeDtypeStruct((e_pad, NLAYER * NE), jnp.float32),
        grid_spec=pltpu.PrefetchScalarGridSpec(
            num_scalar_prefetch=0,
            grid=grid,
            in_specs=[
                pl.BlockSpec((te, NE), lambda i: (i, 0)),
                pl.BlockSpec((NE, 3 * NLAYER * 2 * NE), lambda i: (0, 0)),
                pl.BlockSpec((NLAYER * 2 * NE, NLAYER * NE), lambda i: (0, 0)),
                pl.BlockSpec((NLAYER * 2 * NE, NLAYER * NE), lambda i: (0, 0)),
            ],
            out_specs=pl.BlockSpec((te, NLAYER * NE), lambda i: (i, 0)),
        ),
        compiler_params=pltpu.CompilerParams(
            dimension_semantics=("parallel",),
            vmem_limit_bytes=32 * 1024 * 1024,
        ),
    )(ea_pad, w123, w4a_bd, w4b_bd)


def _ml3_fused_kernel(a_ref, x_ref, wspec_ref, bspec_ref, wg_ref, bg_ref,
                      out_ref, h_ref, xw_ref):
    """All 4 ML3 layers, grid = (layer, row_tile), h carried in VMEM scratch."""
    l = pl.program_id(0)
    i = pl.program_id(1)
    n_pad = h_ref.shape[0]
    tm = out_ref.shape[0]

    # seed the layer carry with the (padded) node features
    @pl.when(jnp.logical_and(l == 0, i == 0))
    def _():
        h_ref[...] = x_ref[...]

    # build XW once per layer: XW[k*N + m, :] = h[m] @ Wspec[l, k]   (bf16 scratch)
    @pl.when(i == 0)
    def _():
        h_all = h_ref[...]
        for k in range(NE):                                    # static unroll
            xw_ref[k * n_pad:(k + 1) * n_pad, :] = jnp.dot(
                h_all, wspec_ref[0, k],
                preferred_element_type=jnp.float32).astype(xw_ref.dtype)

    start = pl.multiple_of(i * tm, 8)
    h_in = h_ref[pl.ds(start, tm), :]                          # this layer's input rows

    # spectral conv: single deep-K bf16 matmul (tm, ne*N) @ (ne*N, 30), f32 acc
    acc = jnp.dot(a_ref[0], xw_ref[...], preferred_element_type=jnp.float32)
    out1 = jax.nn.relu(acc + bspec_ref[0])

    # gating: fc11/fc12 fused into one (F, 4) dot
    t = jnp.tanh(jnp.dot(h_in, wg_ref[0], preferred_element_type=jnp.float32)
                 + bg_ref[0])
    out2 = t[:, :NOUT2] * t[:, NOUT2:]

    out_ref[:, :NOUT1] = out1.astype(out_ref.dtype)
    out_ref[:, NOUT1:] = out2.astype(out_ref.dtype)
    # carry the layer output to the next layer with one full-width store
    h_ref[pl.ds(start, tm), :] = out_ref[...]


def ml3_conv_fused(a_cat, x_pad, wspec_all, bspec_all, wg_all, bg_all, tm):
    """All 4 ML3 layers in one pallas_call (spectral conv + gating, carried h)."""
    _, n_pad, k_dim = a_cat.shape
    f = x_pad.shape[1]
    assert n_pad % tm == 0
    n_tiles = n_pad // tm
    vmem_limit, _ = _vmem_budget_and_tm()
    # TODO(synk): for very large graphs also tile the ne*N contraction axis
    # (reduction grid axis + f32 accumulator scratch) so VMEM use is N-independent,
    # and consider int8 (v5e/v6e) / fp8 (v7x) quantization of a_cat.
    return pl.pallas_call(
        _ml3_fused_kernel,
        out_shape=jax.ShapeDtypeStruct((n_pad, NIN), jnp.float32),
        grid_spec=pltpu.PrefetchScalarGridSpec(
            num_scalar_prefetch=0,
            grid=(NLAYER, n_tiles),
            in_specs=[
                pl.BlockSpec((1, tm, k_dim), lambda l, i: (l, i, 0)),       # A_cat tile (bf16)
                pl.BlockSpec((n_pad, f), lambda l, i: (0, 0)),              # x (resident once)
                pl.BlockSpec((1, NE, f, NOUT1), lambda l, i: (l, 0, 0, 0)), # Wspec[l]
                pl.BlockSpec((1, 1, NOUT1), lambda l, i: (l, 0, 0)),        # bspec[l]
                pl.BlockSpec((1, f, 2 * NOUT2), lambda l, i: (l, 0, 0)),    # [W11|W12][l]
                pl.BlockSpec((1, 1, 2 * NOUT2), lambda l, i: (l, 0, 0)),    # [b11|b12][l]
            ],
            out_specs=pl.BlockSpec((tm, NIN), lambda l, i: (i, 0)),
            scratch_shapes=[
                pltpu.VMEM((n_pad, NIN), jnp.float32),       # h carried across layers
                pltpu.VMEM((k_dim, NOUT1), jnp.bfloat16),    # XW, rebuilt once per layer
            ],
        ),
        compiler_params=pltpu.CompilerParams(
            # TODO(synk): the VMEM layer-carry forces both grid axes sequential;
            # a v7x 2-TensorCore variant needs a core_map + cross-core barrier
            # to split the row axis while sharing XW/h.
            dimension_semantics=("arbitrary", "arbitrary"),
            vmem_limit_bytes=vmem_limit,
        ),
    )(a_cat, x_pad, wspec_all, bspec_all, wg_all, bg_all)


def _head_kernel(p_ref, w1_ref, b1_ref, w2_ref, b2_ref, out_ref):
    h = jax.nn.relu(jnp.dot(p_ref[...], w1_ref[...], preferred_element_type=jnp.float32)
                    + b1_ref[...])
    out_ref[...] = (jnp.dot(h, w2_ref[...], preferred_element_type=jnp.float32)
                    + b2_ref[...]).astype(out_ref.dtype)


def mlp_head(pooled, w1, b1, w2, b2):
    g = pooled.shape[0]
    return pl.pallas_call(
        _head_kernel,
        out_shape=jax.ShapeDtypeStruct((g, w2.shape[1]), jnp.float32),
        in_specs=[_VMEM] * 5,
        out_specs=_VMEM,
        compiler_params=pltpu.CompilerParams(vmem_limit_bytes=32 * 1024 * 1024),
    )(pooled, w1, b1, w2, b2)


# ------------------------------ model glue ----------------------------------

def init_params(key):
    def nrm(k, shape, scale=0.1):
        return scale * jax.random.normal(k, shape, jnp.float32)

    params = {"layers": []}
    ninp = NINP
    for _ in range(NLAYER):
        key, *ks = jax.random.split(key, 11)
        params["layers"].append(dict(
            w_e1=nrm(ks[0], (NE, 2 * NE)),          # fc1_1 (bias=False)
            w_e2=nrm(ks[1], (NE, 2 * NE)),          # fc1_2
            w_e3=nrm(ks[2], (NE, 2 * NE)),          # fc1_3
            w_e4=nrm(ks[3], (4 * NE, NE)),          # fc1_4
            w_spec=nrm(ks[4], (NE, ninp, NOUT1)),   # SpectConv.weight
            b_spec=nrm(ks[5], (1, NOUT1)),          # SpectConv.bias
            w11=nrm(ks[6], (ninp, NOUT2)),          # fc11
            b11=nrm(ks[7], (1, NOUT2)),
            w12=nrm(ks[8], (ninp, NOUT2)),          # fc12
            b12=nrm(ks[9], (1, NOUT2)),
        ))
        ninp = NIN
    key, k1, k2, k3, k4 = jax.random.split(key, 5)
    params["w_fc1"] = nrm(k1, (NIN, HID))
    params["b_fc1"] = nrm(k2, (1, HID))
    params["w_fc2"] = nrm(k3, (HID, 1))
    params["b_fc2"] = nrm(k4, (1, 1))
    return params


def gnnml3_forward(params, x, edge_index, edge_attr, batch, num_graphs):
    n = x.shape[0]
    e = edge_attr.shape[0]
    src, tgt = edge_index[0], edge_index[1]
    layers = params["layers"]
    _, tm_max = _vmem_budget_and_tm()

    # node padding: multiple of 16 (lane-aligns NE*n_pad to 128 for the bf16
    # streamed operand) and of the row tile (even grid; no OOB scratch rows)
    n16 = max(16, -(-n // 16) * 16)
    if n16 <= tm_max:
        tm, n_pad = n16, n16
    else:
        tm = tm_max
        n_pad = -(-n16 // tm) * tm

    # --- fused edge MLPs for all 4 layers (one pallas_call, lane-dense) ---
    w123 = jnp.concatenate(
        [jnp.concatenate([L[k] for L in layers], axis=1)
         for k in ("w_e1", "w_e2", "w_e3")], axis=1)                      # (8, 192)
    w4a_bd = jnp.zeros((NLAYER * 2 * NE, NLAYER * NE), jnp.float32)
    w4b_bd = jnp.zeros((NLAYER * 2 * NE, NLAYER * NE), jnp.float32)
    for l, L in enumerate(layers):
        w4a_bd = w4a_bd.at[l * 2 * NE:(l + 1) * 2 * NE, l * NE:(l + 1) * NE].set(
            L["w_e4"][:2 * NE])
        w4b_bd = w4b_bd.at[l * 2 * NE:(l + 1) * 2 * NE, l * NE:(l + 1) * NE].set(
            L["w_e4"][2 * NE:])
    e8 = max(8, -(-e // 8) * 8)
    te = e8 if e8 <= 1024 else 1024
    e_pad = -(-e8 // te) * te
    ea_pad = jnp.pad(edge_attr, ((0, e_pad - e), (0, 0)))
    ea_out = edge_mlp_all_layers(ea_pad, w123, w4a_bd, w4b_bd, te)        # (e_pad, 32)

    # --- dense supports scatter-added straight into the kernel layout -------
    # a_cat[l, tgt, k*n_pad + src] += ea_l[e, k]; f32 accumulate, one bf16 cast.
    # TODO(synk): the edge-list -> dense-support scatter-add is data dependent
    # and stays in XLA glue; fully fusing it needs an in-kernel scatter driven
    # by scalar-prefetched src/tgt indices.
    vals = ea_out[:e].reshape(e, NLAYER, NE).transpose(1, 0, 2)           # (4, E, 8)
    cols = jnp.arange(NE, dtype=src.dtype)[None, :] * n_pad + src[:, None]  # (E, 8)
    lidx = jnp.arange(NLAYER, dtype=jnp.int32)[:, None, None]
    a_cat = jnp.zeros((NLAYER, n_pad, NE * n_pad), jnp.float32)
    a_cat = a_cat.at[lidx, tgt[None, :, None], cols[None, :, :]].add(vals)
    a_cat = a_cat.astype(jnp.bfloat16)

    # --- stack + pad per-layer conv / gating weights to a uniform F=NIN ------
    def pad_rows(w):
        return jnp.pad(w, ((0, NIN - w.shape[0]), (0, 0)))
    wspec_all = jnp.stack(
        [jnp.pad(L["w_spec"], ((0, 0), (0, NIN - L["w_spec"].shape[1]), (0, 0)))
         for L in layers])                                                # (4, 8, 32, 30)
    bspec_all = jnp.stack([L["b_spec"] for L in layers])                  # (4, 1, 30)
    wg_all = jnp.stack(
        [jnp.concatenate([pad_rows(L["w11"]), pad_rows(L["w12"])], axis=1)
         for L in layers])                                                # (4, 32, 4)
    bg_all = jnp.stack(
        [jnp.concatenate([L["b11"], L["b12"]], axis=1) for L in layers])  # (4, 1, 4)

    x_pad = jnp.pad(x, ((0, n_pad - n), (0, NIN - x.shape[1])))           # (n_pad, 32)

    h = ml3_conv_fused(a_cat, x_pad, wspec_all, bspec_all, wg_all, bg_all, tm)

    # global_add_pool: data-dependent segment sum in glue (no dense one-hot matmul)
    pooled = jax.ops.segment_sum(h[:n], batch, num_segments=num_graphs)
    return mlp_head(pooled, params["w_fc1"], params["b_fc1"],
                    params["w_fc2"], params["b_fc2"])


def gnnml3_reference(params, x, edge_index, edge_attr, batch, num_graphs):
    n = x.shape[0]
    src, tgt = edge_index[0], edge_index[1]
    for layer in params["layers"]:
        h1 = jax.nn.relu(edge_attr @ layer["w_e1"])
        h2 = jax.nn.relu(edge_attr @ layer["w_e2"]) * jax.nn.relu(edge_attr @ layer["w_e3"])
        ea = jax.nn.relu(jnp.concatenate([h1, h2], axis=1) @ layer["w_e4"])
        a = jnp.zeros((NE, n, n), jnp.float32).at[:, tgt, src].add(ea.T)
        acc = jnp.einsum("knm,mf,kfo->no", a, x, layer["w_spec"])
        out1 = jax.nn.relu(acc + layer["b_spec"])
        out2 = (jnp.tanh(x @ layer["w11"] + layer["b11"]) *
                jnp.tanh(x @ layer["w12"] + layer["b12"]))
        x = jnp.concatenate([out1, out2], axis=1)
    pooled = jax.ops.segment_sum(x, batch, num_segments=num_graphs)
    h = jax.nn.relu(pooled @ params["w_fc1"] + params["b_fc1"])
    return h @ params["w_fc2"] + params["b_fc2"]


# --------------------------------- main --------------------------------------

if __name__ == "__main__":
    # Small deterministic batch of 2 ZINC-like molecule graphs (ring topologies).
    sizes = [11, 13]
    src_all, tgt_all, batch_list = [], [], []
    off = 0
    for g, nnodes in enumerate(sizes):
        for i in range(nnodes):
            j = (i + 1) % nnodes
            src_all += [off + i, off + j]
            tgt_all += [off + j, off + i]
        batch_list += [g] * nnodes
        off += nnodes
    n_nodes = off
    edge_index = jnp.array([src_all, tgt_all], dtype=jnp.int32)     # data.edge_index2
    n_edges = edge_index.shape[1]
    batch = jnp.array(batch_list, dtype=jnp.int32)                  # data.batch

    key = jax.random.PRNGKey(0)
    key, kx, ke = jax.random.split(key, 3)
    x = jax.random.normal(kx, (n_nodes, NINP), jnp.float32)         # data.x
    edge_attr = jnp.abs(jax.random.normal(ke, (n_edges, NE), jnp.float32))  # data.edge_attr2
    params = init_params(key)

    fwd = jax.jit(gnnml3_forward, static_argnums=(5,))
    out = fwd(params, x, edge_index, edge_attr, batch, len(sizes))
    out = jax.block_until_ready(out)

    ref = gnnml3_reference(params, x, edge_index, edge_attr, batch, len(sizes))
    np.testing.assert_allclose(np.asarray(out), np.asarray(ref), rtol=2e-2, atol=2e-2)
    assert out.shape == (len(sizes), 1)

    print("KERNEL_OK")
</pallas_src>

<mosaic_0001>
module attributes {stable_mosaic.version = 11 : i64} {
  func.func private @main(%arg0: i32) attributes {dimension_semantics = [#tpu.dimension_semantics<core_parallel>], iteration_bounds = array<i64: 2>, tpu.core_type = #tpu.core_type<sc_scalar_subcore>, window_params = []} {
    return
  }
}

module attributes {stable_mosaic.version = 11 : i64} {
  func.func private @main(%arg0: i32) attributes {dimension_semantics = [#tpu.dimension_semantics<core_parallel>], iteration_bounds = array<i64: 2>, tpu.core_type = #tpu.core_type<sc_scalar_subcore>, window_params = []} {
    return
  }
}

module attributes {stable_mosaic.version = 11 : i64} {
  func.func @_edge_mlp_kernel(%arg0: i32, %arg1: memref<48x8xf32, #tpu.memory_space<vmem>>, %arg2: memref<8x192xf32, #tpu.memory_space<vmem>>, %arg3: memref<64x32xf32, #tpu.memory_space<vmem>>, %arg4: memref<64x32xf32, #tpu.memory_space<vmem>>, %arg5: memref<48x32xf32, #tpu.memory_space<vmem>>) attributes {dimension_semantics = [#tpu.dimension_semantics<parallel>], iteration_bounds = array<i64: 1>, scalar_prefetch = 0 : i64, scratch_operands = 0 : i64, tpu.core_type = #tpu.core_type<tc>, window_params = [{transform_indices = @transform_0, window_bounds = array<i64: 48, 8>}, {pipeline_mode = #tpu.pipeline_mode<synchronous>, transform_indices = @transform_1, window_bounds = array<i64: 8, 192>}, {pipeline_mode = #tpu.pipeline_mode<synchronous>, transform_indices = @transform_2, window_bounds = array<i64: 64, 32>}, {pipeline_mode = #tpu.pipeline_mode<synchronous>, transform_indices = @transform_3, window_bounds = array<i64: 64, 32>}, {transform_indices = @transform_4, window_bounds = array<i64: 48, 32>}]} {
    %c0 = arith.constant 0 : index
    %c0_0 = arith.constant 0 : index
    %0 = vector.load %arg1[%c0, %c0_0] : memref<48x8xf32, #tpu.memory_space<vmem>>, vector<48x8xf32>
    %c0_1 = arith.constant 0 : index
    %c0_2 = arith.constant 0 : index
    %1 = vector.load %arg2[%c0_1, %c0_2] : memref<8x192xf32, #tpu.memory_space<vmem>>, vector<8x192xf32>
    %cst = arith.constant dense<0.000000e+00> : vector<48x192xf32>
    %2 = tpu.matmul %0, %1, %cst {dimension_numbers = #tpu.dot_dimension_numbers<[1], [0], [0], [1], [0, 0, 1, 1], [], []>} : vector<48x8xf32>, vector<8x192xf32>, vector<48x192xf32> -> vector<48x192xf32>
    %3 = vector.extract_strided_slice %2 {offsets = [0, 0], sizes = [48, 64], strides = [1, 1]} : vector<48x192xf32> to vector<48x64xf32>
    %cst_3 = arith.constant 0.000000e+00 : f32
    %4 = vector.broadcast %cst_3 : f32 to vector<48x64xf32>
    %5 = arith.maximumf %3, %4 : vector<48x64xf32>
    %6 = vector.extract_strided_slice %2 {offsets = [0, 64], sizes = [48, 64], strides = [1, 1]} : vector<48x192xf32> to vector<48x64xf32>
    %cst_4 = arith.constant 0.000000e+00 : f32
    %7 = vector.broadcast %cst_4 : f32 to vector<48x64xf32>
    %8 = arith.maximumf %6, %7 : vector<48x64xf32>
    %9 = vector.extract_strided_slice %2 {offsets = [0, 128], sizes = [48, 64], strides = [1, 1]} : vector<48x192xf32> to vector<48x64xf32>
    %cst_5 = arith.constant 0.000000e+00 : f32
    %10 = vector.broadcast %cst_5 : f32 to vector<48x64xf32>
    %11 = arith.maximumf %9, %10 : vector<48x64xf32>
    %12 = arith.mulf %8, %11 : vector<48x64xf32>
    %c0_6 = arith.constant 0 : index
    %c0_7 = arith.constant 0 : index
    %13 = vector.load %arg3[%c0_6, %c0_7] : memref<64x32xf32, #tpu.memory_space<vmem>>, vector<64x32xf32>
    %cst_8 = arith.constant dense<0.000000e+00> : vector<48x32xf32>
    %14 = tpu.matmul %5, %13, %cst_8 {dimension_numbers = #tpu.dot_dimension_numbers<[1], [0], [0], [1], [0, 0, 1, 1], [], []>} : vector<48x64xf32>, vector<64x32xf32>, vector<48x32xf32> -> vector<48x32xf32>
    %c0_9 = arith.constant 0 : index
    %c0_10 = arith.constant 0 : index
    %15 = vector.load %arg4[%c0_9, %c0_10] : memref<64x32xf32, #tpu.memory_space<vmem>>, vector<64x32xf32>
    %cst_11 = arith.constant dense<0.000000e+00> : vector<48x32xf32>
    %16 = tpu.matmul %12, %15, %cst_11 {dimension_numbers = #tpu.dot_dimension_numbers<[1], [0], [0], [1], [0, 0, 1, 1], [], []>} : vector<48x64xf32>, vector<64x32xf32>, vector<48x32xf32> -> vector<48x32xf32>
    %17 = arith.addf %14, %16 : vector<48x32xf32>
    %cst_12 = arith.constant 0.000000e+00 : f32
    %18 = vector.broadcast %cst_12 : f32 to vector<48x32xf32>
    %19 = arith.maximumf %17, %18 : vector<48x32xf32>
    %c0_13 = arith.constant 0 : index
    %c0_14 = arith.constant 0 : index
    %20 = vector.load %arg5[%c0_13, %c0_14] : memref<48x32xf32, #tpu.memory_space<vmem>>, vector<48x32xf32>
    tpu.vector_store %arg5[%c0_13, %c0_14], %19 {strides = array<i32>} : memref<48x32xf32, #tpu.memory_space<vmem>>, vector<48x32xf32>,
    return
  }
  func.func @transform_0(%arg0: i32) -> (i32, i32) {
    %c0_i32 = arith.constant 0 : i32
    %c0_i32_0 = arith.constant 0 : i32
    return %arg0, %c0_i32 : i32, i32
  }
  func.func @transform_1(%arg0: i32) -> (i32, i32) {
    %c0_i32 = arith.constant 0 : i32
    %c0_i32_0 = arith.constant 0 : i32
    %c0_i32_1 = arith.constant 0 : i32
    return %c0_i32, %c0_i32_0 : i32, i32
  }
  func.func @transform_2(%arg0: i32) -> (i32, i32) {
    %c0_i32 = arith.constant 0 : i32
    %c0_i32_0 = arith.constant 0 : i32
    %c0_i32_1 = arith.constant 0 : i32
    return %c0_i32, %c0_i32_0 : i32, i32
  }
  func.func @transform_3(%arg0: i32) -> (i32, i32) {
    %c0_i32 = arith.constant 0 : i32
    %c0_i32_0 = arith.constant 0 : i32
    %c0_i32_1 = arith.constant 0 : i32
    return %c0_i32, %c0_i32_0 : i32, i32
  }
  func.func @transform_4(%arg0: i32) -> (i32, i32) {
    %c0_i32 = arith.constant 0 : i32
    %c0_i32_0 = arith.constant 0 : i32
    return %arg0, %c0_i32 : i32, i32
  }
}

module attributes {stable_mosaic.version = 11 : i64} {
  func.func @_ml3_fused_kernel(%arg0: i32, %arg1: i32, %arg2: memref<1x32x256xbf16, #tpu.memory_space<vmem>>, %arg3: memref<32x32xf32, #tpu.memory_space<vmem>>, %arg4: memref<1x8x32x30xf32, #tpu.memory_space<vmem>>, %arg5: memref<1x1x30xf32, #tpu.memory_space<vmem>>, %arg6: memref<1x32x4xf32, #tpu.memory_space<vmem>>, %arg7: memref<1x1x4xf32, #tpu.memory_space<vmem>>, %arg8: memref<32x32xf32, #tpu.memory_space<vmem>>, %arg9: memref<32x32xf32, #tpu.memory_space<vmem>>, %arg10: memref<256x30xbf16, #tpu.memory_space<vmem>>) attributes {dimension_semantics = [#tpu.dimension_semantics<arbitrary>, #tpu.dimension_semantics<arbitrary>], iteration_bounds = array<i64: 4, 1>, scalar_prefetch = 0 : i64, scratch_operands = 2 : i64, tpu.core_type = #tpu.core_type<tc>, window_params = [{transform_indices = @transform_0, window_bounds = array<i64: 1, 32, 256>}, {pipeline_mode = #tpu.pipeline_mode<synchronous>, transform_indices = @transform_1, window_bounds = array<i64: 32, 32>}, {transform_indices = @transform_2, window_bounds = array<i64: 1, 8, 32, 30>}, {transform_indices = @transform_3, window_bounds = array<i64: 1, 1, 30>}, {transform_indices = @transform_4, window_bounds = array<i64: 1, 32, 4>}, {transform_indices = @transform_5, window_bounds = array<i64: 1, 1, 4>}, {transform_indices = @transform_6, window_bounds = array<i64: 32, 32>}]} {
    %c0_i32 = arith.constant 0 : i32
    %0 = arith.cmpi eq, %arg0, %c0_i32 : i32
    %c0_i32_0 = arith.constant 0 : i32
    %1 = arith.cmpi eq, %arg1, %c0_i32_0 : i32
    %2 = arith.andi %0, %1 : i1
    %3 = arith.extui %2 : i1 to i32
    %c0_i32_1 = arith.constant 0 : i32
    %4 = arith.cmpi ne, %3, %c0_i32_1 : i32
    scf.if %4 {
      %c0_26 = arith.constant 0 : index
      %c0_27 = arith.constant 0 : index
      %38 = vector.load %arg3[%c0_26, %c0_27] : memref<32x32xf32, #tpu.memory_space<vmem>>, vector<32x32xf32>
      %c0_28 = arith.constant 0 : index
      %c0_29 = arith.constant 0 : index
      %39 = vector.load %arg9[%c0_28, %c0_29] : memref<32x32xf32, #tpu.memory_space<vmem>>, vector<32x32xf32>
      tpu.vector_store %arg9[%c0_28, %c0_29], %38 {strides = array<i32>} : memref<32x32xf32, #tpu.memory_space<vmem>>, vector<32x32xf32>,
    } else {
    }
    %c0_i32_2 = arith.constant 0 : i32
    %5 = arith.cmpi eq, %arg1, %c0_i32_2 : i32
    %6 = arith.extui %5 : i1 to i32
    %c0_i32_3 = arith.constant 0 : i32
    %7 = arith.cmpi ne, %6, %c0_i32_3 : i32
    scf.if %7 {
      %c0_26 = arith.constant 0 : index
      %c0_27 = arith.constant 0 : index
      %38 = vector.load %arg9[%c0_26, %c0_27] : memref<32x32xf32, #tpu.memory_space<vmem>>, vector<32x32xf32>
      %c0_28 = arith.constant 0 : index
      %c0_29 = arith.constant 0 : index
      %c0_30 = arith.constant 0 : index
      %c0_31 = arith.constant 0 : index
      %39 = vector.load %arg4[%c0_28, %c0_29, %c0_30, %c0_31] : memref<1x8x32x30xf32, #tpu.memory_space<vmem>>, vector<1x1x32x30xf32>
      %40 = vector.shape_cast %39 : vector<1x1x32x30xf32> to vector<32x30xf32>
      %cst_32 = arith.constant dense<0.000000e+00> : vector<32x30xf32>
      %41 = tpu.matmul %38, %40, %cst_32 {dimension_numbers = #tpu.dot_dimension_numbers<[1], [0], [0], [1], [0, 0, 1, 1], [], []>} : vector<32x32xf32>, vector<32x30xf32>, vector<32x30xf32> -> vector<32x30xf32>
      %42 = arith.truncf %41 : vector<32x30xf32> to vector<32x30xbf16>
      %c0_33 = arith.constant 0 : index
      %c0_34 = arith.constant 0 : index
      %43 = vector.load %arg10[%c0_33, %c0_34] : memref<256x30xbf16, #tpu.memory_space<vmem>>, vector<32x30xbf16>
      tpu.vector_store %arg10[%c0_33, %c0_34], %42 {strides = array<i32>} : memref<256x30xbf16, #tpu.memory_space<vmem>>, vector<32x30xbf16>,
      %c0_35 = arith.constant 0 : index
      %c1 = arith.constant 1 : index
      %c0_36 = arith.constant 0 : index
      %c0_37 = arith.constant 0 : index
      %44 = vector.load %arg4[%c0_35, %c1, %c0_36, %c0_37] : memref<1x8x32x30xf32, #tpu.memory_space<vmem>>, vector<1x1x32x30xf32>
      %45 = vector.shape_cast %44 : vector<1x1x32x30xf32> to vector<32x30xf32>
      %cst_38 = arith.constant dense<0.000000e+00> : vector<32x30xf32>
      %46 = tpu.matmul %38, %45, %cst_38 {dimension_numbers = #tpu.dot_dimension_numbers<[1], [0], [0], [1], [0, 0, 1, 1], [], []>} : vector<32x32xf32>, vector<32x30xf32>, vector<32x30xf32> -> vector<32x30xf32>
      %47 = arith.truncf %46 : vector<32x30xf32> to vector<32x30xbf16>
      %c32 = arith.constant 32 : index
      %c0_39 = arith.constant 0 : index
      %48 = vector.load %arg10[%c32, %c0_39] : memref<256x30xbf16, #tpu.memory_space<vmem>>, vector<32x30xbf16>
      tpu.vector_store %arg10[%c32, %c0_39], %47 {strides = array<i32>} : memref<256x30xbf16, #tpu.memory_space<vmem>>, vector<32x30xbf16>,
      %c0_40 = arith.constant 0 : index
      %c2 = arith.constant 2 : index
      %c0_41 = arith.constant 0 : index
      %c0_42 = arith.constant 0 : index
      %49 = vector.load %arg4[%c0_40, %c2, %c0_41, %c0_42] : memref<1x8x32x30xf32, #tpu.memory_space<vmem>>, vector<1x1x32x30xf32>
      %50 = vector.shape_cast %49 : vector<1x1x32x30xf32> to vector<32x30xf32>
      %cst_43 = arith.constant dense<0.000000e+00> : vector<32x30xf32>
      %51 = tpu.matmul %38, %50, %cst_43 {dimension_numbers = #tpu.dot_dimension_numbers<[1], [0], [0], [1], [0, 0, 1, 1], [], []>} : vector<32x32xf32>, vector<32x30xf32>, vector<32x30xf32> -> vector<32x30xf32>
      %52 = arith.truncf %51 : vector<32x30xf32> to vector<32x30xbf16>
      %c64 = arith.constant 64 : index
      %c0_44 = arith.constant 0 : index
      %53 = vector.load %arg10[%c64, %c0_44] : memref<256x30xbf16, #tpu.memory_space<vmem>>, vector<32x30xbf16>
      tpu.vector_store %arg10[%c64, %c0_44], %52 {strides = array<i32>} : memref<256x30xbf16, #tpu.memory_space<vmem>>, vector<32x30xbf16>,
      %c0_45 = arith.constant 0 : index
      %c3 = arith.constant 3 : index
      %c0_46 = arith.constant 0 : index
      %c0_47 = arith.constant 0 : index
      %54 = vector.load %arg4[%c0_45, %c3, %c0_46, %c0_47] : memref<1x8x32x30xf32, #tpu.memory_space<vmem>>, vector<1x1x32x30xf32>
      %55 = vector.shape_cast %54 : vector<1x1x32x30xf32> to vector<32x30xf32>
      %cst_48 = arith.constant dense<0.000000e+00> : vector<32x30xf32>
      %56 = tpu.matmul %38, %55, %cst_48 {dimension_numbers = #tpu.dot_dimension_numbers<[1], [0], [0], [1], [0, 0, 1, 1], [], []>} : vector<32x32xf32>, vector<32x30xf32>, vector<32x30xf32> -> vector<32x30xf32>
      %57 = arith.truncf %56 : vector<32x30xf32> to vector<32x30xbf16>
      %c96 = arith.constant 96 : index
      %c0_49 = arith.constant 0 : index
      %58 = vector.load %arg10[%c96, %c0_49] : memref<256x30xbf16, #tpu.memory_space<vmem>>, vector<32x30xbf16>
      tpu.vector_store %arg10[%c96, %c0_49], %57 {strides = array<i32>} : memref<256x30xbf16, #tpu.memory_space<vmem>>, vector<32x30xbf16>,
      %c0_50 = arith.constant 0 : index
      %c4 = arith.constant 4 : index
      %c0_51 = arith.constant 0 : index
      %c0_52 = arith.constant 0 : index
      %59 = vector.load %arg4[%c0_50, %c4, %c0_51, %c0_52] : memref<1x8x32x30xf32, #tpu.memory_space<vmem>>, vector<1x1x32x30xf32>
      %60 = vector.shape_cast %59 : vector<1x1x32x30xf32> to vector<32x30xf32>
      %cst_53 = arith.constant dense<0.000000e+00> : vector<32x30xf32>
      %61 = tpu.matmul %38, %60, %cst_53 {dimension_numbers = #tpu.dot_dimension_numbers<[1], [0], [0], [1], [0, 0, 1, 1], [], []>} : vector<32x32xf32>, vector<32x30xf32>, vector<32x30xf32> -> vector<32x30xf32>
      %62 = arith.truncf %61 : vector<32x30xf32> to vector<32x30xbf16>
      %c128 = arith.constant 128 : index
      %c0_54 = arith.constant 0 : index
      %63 = vector.load %arg10[%c128, %c0_54] : memref<256x30xbf16, #tpu.memory_space<vmem>>, vector<32x30xbf16>
      tpu.vector_store %arg10[%c128, %c0_54], %62 {strides = array<i32>} : memref<256x30xbf16, #tpu.memory_space<vmem>>, vector<32x30xbf16>,
      %c0_55 = arith.constant 0 : index
      %c5 = arith.constant 5 : index
      %c0_56 = arith.constant 0 : index
      %c0_57 = arith.constant 0 : index
      %64 = vector.load %arg4[%c0_55, %c5, %c0_56, %c0_57] : memref<1x8x32x30xf32, #tpu.memory_space<vmem>>, vector<1x1x32x30xf32>
      %65 = vector.shape_cast %64 : vector<1x1x32x30xf32> to vector<32x30xf32>
      %cst_58 = arith.constant dense<0.000000e+00> : vector<32x30xf32>
      %66 = tpu.matmul %38, %65, %cst_58 {dimension_numbers = #tpu.dot_dimension_numbers<[1], [0], [0], [1], [0, 0, 1, 1], [], []>} : vector<32x32xf32>, vector<32x30xf32>, vector<32x30xf32> -> vector<32x30xf32>
      %67 = arith.truncf %66 : vector<32x30xf32> to vector<32x30xbf16>
      %c160 = arith.constant 160 : index
      %c0_59 = arith.constant 0 : index
      %68 = vector.load %arg10[%c160, %c0_59] : memref<256x30xbf16, #tpu.memory_space<vmem>>, vector<32x30xbf16>
      tpu.vector_store %arg10[%c160, %c0_59], %67 {strides = array<i32>} : memref<256x30xbf16, #tpu.memory_space<vmem>>, vector<32x30xbf16>,
      %c0_60 = arith.constant 0 : index
      %c6 = arith.constant 6 : index
      %c0_61 = arith.constant 0 : index
      %c0_62 = arith.constant 0 : index
      %69 = vector.load %arg4[%c0_60, %c6, %c0_61, %c0_62] : memref<1x8x32x30xf32, #tpu.memory_space<vmem>>, vector<1x1x32x30xf32>
      %70 = vector.shape_cast %69 : vector<1x1x32x30xf32> to vector<32x30xf32>
      %cst_63 = arith.constant dense<0.000000e+00> : vector<32x30xf32>
      %71 = tpu.matmul %38, %70, %cst_63 {dimension_numbers = #tpu.dot_dimension_numbers<[1], [0], [0], [1], [0, 0, 1, 1], [], []>} : vector<32x32xf32>, vector<32x30xf32>, vector<32x30xf32> -> vector<32x30xf32>
      %72 = arith.truncf %71 : vector<32x30xf32> to vector<32x30xbf16>
      %c192 = arith.constant 192 : index
      %c0_64 = arith.constant 0 : index
      %73 = vector.load %arg10[%c192, %c0_64] : memref<256x30xbf16, #tpu.memory_space<vmem>>, vector<32x30xbf16>
      tpu.vector_store %arg10[%c192, %c0_64], %72 {strides = array<i32>} : memref<256x30xbf16, #tpu.memory_space<vmem>>, vector<32x30xbf16>,
      %c0_65 = arith.constant 0 : index
      %c7 = arith.constant 7 : index
      %c0_66 = arith.constant 0 : index
      %c0_67 = arith.constant 0 : index
      %74 = vector.load %arg4[%c0_65, %c7, %c0_66, %c0_67] : memref<1x8x32x30xf32, #tpu.memory_space<vmem>>, vector<1x1x32x30xf32>
      %75 = vector.shape_cast %74 : vector<1x1x32x30xf32> to vector<32x30xf32>
      %cst_68 = arith.constant dense<0.000000e+00> : vector<32x30xf32>
      %76 = tpu.matmul %38, %75, %cst_68 {dimension_numbers = #tpu.dot_dimension_numbers<[1], [0], [0], [1], [0, 0, 1, 1], [], []>} : vector<32x32xf32>, vector<32x30xf32>, vector<32x30xf32> -> vector<32x30xf32>
      %77 = arith.truncf %76 : vector<32x30xf32> to vector<32x30xbf16>
      %c224 = arith.constant 224 : index
      %c0_69 = arith.constant 0 : index
      %78 = vector.load %arg10[%c224, %c0_69] : memref<256x30xbf16, #tpu.memory_space<vmem>>, vector<32x30xbf16>
      tpu.vector_store %arg10[%c224, %c0_69], %77 {strides = array<i32>} : memref<256x30xbf16, #tpu.memory_space<vmem>>, vector<32x30xbf16>,
    } else {
    }
    %c32_i32 = arith.constant 32 : i32
    %8 = arith.muli %arg1, %c32_i32 : i32
    %9 = tpu.assume_multiple %8, 8 : i32
    %10 = arith.index_cast %9 : i32 to index
    %c0 = arith.constant 0 : index
    %11 = vector.load %arg9[%10, %c0] : memref<32x32xf32, #tpu.memory_space<vmem>>, vector<32x32xf32>
    %c0_4 = arith.constant 0 : index
    %c0_5 = arith.constant 0 : index
    %c0_6 = arith.constant 0 : index
    %12 = vector.load %arg2[%c0_4, %c0_5, %c0_6] : memref<1x32x256xbf16, #tpu.memory_space<vmem>>, vector<1x32x256xbf16>
    %13 = vector.shape_cast %12 : vector<1x32x256xbf16> to vector<32x256xbf16>
    %c0_7 = arith.constant 0 : index
    %c0_8 = arith.constant 0 : index
    %14 = vector.load %arg10[%c0_7, %c0_8] : memref<256x30xbf16, #tpu.memory_space<vmem>>, vector<256x30xbf16>
    %cst = arith.constant dense<0.000000e+00> : vector<32x30xf32>
    %15 = tpu.matmul %13, %14, %cst {dimension_numbers = #tpu.dot_dimension_numbers<[1], [0], [0], [1], [0, 0, 1, 1], [], []>} : vector<32x256xbf16>, vector<256x30xbf16>, vector<32x30xf32> -> vector<32x30xf32>
    %c0_9 = arith.constant 0 : index
    %c0_10 = arith.constant 0 : index
    %c0_11 = arith.constant 0 : index
    %16 = vector.load %arg5[%c0_9, %c0_10, %c0_11] : memref<1x1x30xf32, #tpu.memory_space<vmem>>, vector<1x1x30xf32>
    %17 = vector.shape_cast %16 : vector<1x1x30xf32> to vector<1x30xf32>
    %18 = vector.broadcast %17 : vector<1x30xf32> to vector<32x30xf32>
    %19 = arith.addf %15, %18 : vector<32x30xf32>
    %cst_12 = arith.constant 0.000000e+00 : f32
    %20 = vector.broadcast %cst_12 : f32 to vector<32x30xf32>
    %21 = arith.maximumf %19, %20 : vector<32x30xf32>
    %c0_13 = arith.constant 0 : index
    %c0_14 = arith.constant 0 : index
    %c0_15 = arith.constant 0 : index
    %22 = vector.load %arg6[%c0_13, %c0_14, %c0_15] : memref<1x32x4xf32, #tpu.memory_space<vmem>>, vector<1x32x4xf32>
    %23 = vector.shape_cast %22 : vector<1x32x4xf32> to vector<32x4xf32>
    %cst_16 = arith.constant dense<0.000000e+00> : vector<32x4xf32>
    %24 = tpu.matmul %11, %23, %cst_16 {dimension_numbers = #tpu.dot_dimension_numbers<[1], [0], [0], [1], [0, 0, 1, 1], [], []>} : vector<32x32xf32>, vector<32x4xf32>, vector<32x4xf32> -> vector<32x4xf32>
    %c0_17 = arith.constant 0 : index
    %c0_18 = arith.constant 0 : index
    %c0_19 = arith.constant 0 : index
    %25 = vector.load %arg7[%c0_17, %c0_18, %c0_19] : memref<1x1x4xf32, #tpu.memory_space<vmem>>, vector<1x1x4xf32>
    %26 = vector.shape_cast %25 : vector<1x1x4xf32> to vector<1x4xf32>
    %27 = vector.broadcast %26 : vector<1x4xf32> to vector<32x4xf32>
    %28 = arith.addf %24, %27 : vector<32x4xf32>
    %29 = math.tanh %28 : vector<32x4xf32>
    %30 = vector.extract_strided_slice %29 {offsets = [0, 0], sizes = [32, 2], strides = [1, 1]} : vector<32x4xf32> to vector<32x2xf32>
    %31 = vector.extract_strided_slice %29 {offsets = [0, 2], sizes = [32, 2], strides = [1, 1]} : vector<32x4xf32> to vector<32x2xf32>
    %32 = arith.mulf %30, %31 : vector<32x2xf32>
    %c0_20 = arith.constant 0 : index
    %c0_21 = arith.constant 0 : index
    %33 = vector.load %arg8[%c0_20, %c0_21] : memref<32x32xf32, #tpu.memory_space<vmem>>, vector<32x30xf32>
    tpu.vector_store %arg8[%c0_20, %c0_21], %21 {strides = array<i32>} : memref<32x32xf32, #tpu.memory_space<vmem>>, vector<32x30xf32>,
    %c0_22 = arith.constant 0 : index
    %c30 = arith.constant 30 : index
    %34 = vector.load %arg8[%c0_22, %c30] : memref<32x32xf32, #tpu.memory_space<vmem>>, vector<32x2xf32>
    tpu.vector_store %arg8[%c0_22, %c30], %32 {strides = array<i32>} : memref<32x32xf32, #tpu.memory_space<vmem>>, vector<32x2xf32>,
    %c0_23 = arith.constant 0 : index
    %c0_24 = arith.constant 0 : index
    %35 = vector.load %arg8[%c0_23, %c0_24] : memref<32x32xf32, #tpu.memory_space<vmem>>, vector<32x32xf32>
    %36 = arith.index_cast %9 : i32 to index
    %c0_25 = arith.constant 0 : index
    %37 = vector.load %arg9[%36, %c0_25] : memref<32x32xf32, #tpu.memory_space<vmem>>, vector<32x32xf32>
    tpu.vector_store %arg9[%36, %c0_25], %35 {strides = array<i32>} : memref<32x32xf32, #tpu.memory_space<vmem>>, vector<32x32xf32>,
    return
  }
  func.func @transform_0(%arg0: i32, %arg1: i32) -> (i32, i32, i32) {
    %c0_i32 = arith.constant 0 : i32
    %c0_i32_0 = arith.constant 0 : i32
    return %arg0, %arg1, %c0_i32 : i32, i32, i32
  }
  func.func @transform_1(%arg0: i32, %arg1: i32) -> (i32, i32) {
    %c0_i32 = arith.constant 0 : i32
    %c0_i32_0 = arith.constant 0 : i32
    %c0_i32_1 = arith.constant 0 : i32
    return %c0_i32, %c0_i32_0 : i32, i32
  }
  func.func @transform_2(%arg0: i32, %arg1: i32) -> (i32, i32, i32, i32) {
    %c0_i32 = arith.constant 0 : i32
    %c0_i32_0 = arith.constant 0 : i32
    %c0_i32_1 = arith.constant 0 : i32
    %c0_i32_2 = arith.constant 0 : i32
    return %arg0, %c0_i32, %c0_i32_0, %c0_i32_1 : i32, i32, i32, i32
  }
  func.func @transform_3(%arg0: i32, %arg1: i32) -> (i32, i32, i32) {
    %c0_i32 = arith.constant 0 : i32
    %c0_i32_0 = arith.constant 0 : i32
    %c0_i32_1 = arith.constant 0 : i32
    return %arg0, %c0_i32, %c0_i32_0 : i32, i32, i32
  }
  func.func @transform_4(%arg0: i32, %arg1: i32) -> (i32, i32, i32) {
    %c0_i32 = arith.constant 0 : i32
    %c0_i32_0 = arith.constant 0 : i32
    %c0_i32_1 = arith.constant 0 : i32
    return %arg0, %c0_i32, %c0_i32_0 : i32, i32, i32
  }
  func.func @transform_5(%arg0: i32, %arg1: i32) -> (i32, i32, i32) {
    %c0_i32 = arith.constant 0 : i32
    %c0_i32_0 = arith.constant 0 : i32
    %c0_i32_1 = arith.constant 0 : i32
    return %arg0, %c0_i32, %c0_i32_0 : i32, i32, i32
  }
  func.func @transform_6(%arg0: i32, %arg1: i32) -> (i32, i32) {
    %c0_i32 = arith.constant 0 : i32
    %c0_i32_0 = arith.constant 0 : i32
    return %arg1, %c0_i32 : i32, i32
  }
}

module attributes {stable_mosaic.version = 11 : i64} {
  func.func @_head_kernel(%arg0: memref<2x32xf32, #tpu.memory_space<vmem>>, %arg1: memref<32x32xf32, #tpu.memory_space<vmem>>, %arg2: memref<1x32xf32, #tpu.memory_space<vmem>>, %arg3: memref<32x1xf32, #tpu.memory_space<vmem>>, %arg4: memref<1x1xf32, #tpu.memory_space<vmem>>, %arg5: memref<2x1xf32, #tpu.memory_space<vmem>>) attributes {dimension_semantics = [], scalar_prefetch = 0 : i64, scratch_operands = 0 : i64, tpu.core_type = #tpu.core_type<tc>} {
    %c0 = arith.constant 0 : index
    %c0_0 = arith.constant 0 : index
    %0 = vector.load %arg0[%c0, %c0_0] : memref<2x32xf32, #tpu.memory_space<vmem>>, vector<2x32xf32>
    %c0_1 = arith.constant 0 : index
    %c0_2 = arith.constant 0 : index
    %1 = vector.load %arg1[%c0_1, %c0_2] : memref<32x32xf32, #tpu.memory_space<vmem>>, vector<32x32xf32>
    %cst = arith.constant dense<0.000000e+00> : vector<2x32xf32>
    %2 = tpu.matmul %0, %1, %cst {dimension_numbers = #tpu.dot_dimension_numbers<[1], [0], [0], [1], [0, 0, 1, 1], [], []>} : vector<2x32xf32>, vector<32x32xf32>, vector<2x32xf32> -> vector<2x32xf32>
    %c0_3 = arith.constant 0 : index
    %c0_4 = arith.constant 0 : index
    %3 = vector.load %arg2[%c0_3, %c0_4] : memref<1x32xf32, #tpu.memory_space<vmem>>, vector<1x32xf32>
    %4 = vector.broadcast %3 : vector<1x32xf32> to vector<2x32xf32>
    %5 = arith.addf %2, %4 : vector<2x32xf32>
    %cst_5 = arith.constant 0.000000e+00 : f32
    %6 = vector.broadcast %cst_5 : f32 to vector<2x32xf32>
    %7 = arith.maximumf %5, %6 : vector<2x32xf32>
    %c0_6 = arith.constant 0 : index
    %c0_7 = arith.constant 0 : index
    %8 = vector.load %arg3[%c0_6, %c0_7] : memref<32x1xf32, #tpu.memory_space<vmem>>, vector<32x1xf32>
    %cst_8 = arith.constant dense<0.000000e+00> : vector<2x1xf32>
    %9 = tpu.matmul %7, %8, %cst_8 {dimension_numbers = #tpu.dot_dimension_numbers<[1], [0], [0], [1], [0, 0, 1, 1], [], []>} : vector<2x32xf32>, vector<32x1xf32>, vector<2x1xf32> -> vector<2x1xf32>
    %c0_9 = arith.constant 0 : index
    %c0_10 = arith.constant 0 : index
    %10 = vector.load %arg4[%c0_9, %c0_10] : memref<1x1xf32, #tpu.memory_space<vmem>>, vector<1x1xf32>
    %11 = vector.broadcast %10 : vector<1x1xf32> to vector<2x1xf32>
    %12 = arith.addf %9, %11 : vector<2x1xf32>
    %c0_11 = arith.constant 0 : index
    %c0_12 = arith.constant 0 : index
    %13 = vector.load %arg5[%c0_11, %c0_12] : memref<2x1xf32, #tpu.memory_space<vmem>>, vector<2x1xf32>
    tpu.vector_store %arg5[%c0_11, %c0_12], %12 {strides = array<i32>} : memref<2x1xf32, #tpu.memory_space<vmem>>, vector<2x1xf32>,
    return
  }
}

</mosaic_0001>

<bundles_post_ra>
// kernel: gnnml3_forward.3
= control target key start
LH: loop header
LB: loop body
LE: loop exit
PB: predicated region body
PF: predicated region fallthrough
CT: control target
= control target key end

     0   :  { %v603_v2 = vmov 0.0   ;;  %vm25_vm0 = vcmask 64512   ;;  %vm221_vm1 = vcmask 523264   ;;  %vm448_vm2 = vcmask 261120   ;;  %s786_s1 = inlined_call_operand.vmem [shape: f32[8,192], index: 1, kind: input, shape index: {}]   ;;  %s787_s0 = inlined_call_operand.vmem [shape: f32[48,8], index: 0, kind: input, shape index: {}]   ;;  %s788_s2 = inlined_call_operand.vmem [shape: f32[64,32], index: 2, kind: input, shape index: {}]   ;;  %s789_s3 = inlined_call_operand.vmem [shape: f32[64,32], index: 3, kind: input, shape index: {}]   ;;  %s790_s4 = inlined_call_operand.vmem [shape: f32[48,32], index: 4, kind: output, shape index: {}]  }
   0x1   :  { %v24_v0 = vld [vmem:[%s786_s1 + $0x8] sm:$0xff]  ;;  %v23_v1 = vld [vmem:[%s786_s1] sm:$0xff]  ;;  %108 = vmatprep.mubr.f32.mxu0 %v603_v2  ;;  %v189_v6 = vld [vmem:[%s788_s2 + $0x10] sm:$0xff] }
   0x2   :  { %v17_v3 = vld [vmem:[%s787_s0] sm:$0xff]  ;;  %44 = vmatprep.subr.mxu0 %v24_v0  ;;  %v188_v5 = vld [vmem:[%s788_s2 + $0x8] sm:$0xff]  ;;  %v190_v7 = vld [vmem:[%s788_s2 + $0x18] sm:$0xff] }
   0x3   :  { %45 = vmatpush1.msra.mxu0 %v23_v1  ;;  %v187_v4 = vld [vmem:[%s788_s2] sm:$0xff]  ;;  %v18_v8 = vld [vmem:[%s787_s0 + $0x8] sm:$0xff]  ;;  %v657_v10 = vpack.c.bf16 %v190_v7, %v189_v6  ;;  %v19_v13 = vld [vmem:[%s787_s0 + $0x10] sm:$0xff] }
   0x4   :  { %459 = vmatmul.mubr.msk.f32.vlgmr.msra.gmra.mrb[0].mxu0 %vm25_vm0, %v17_v3  ;;  %v655_v9 = vpack.c.bf16 %v188_v5, %v187_v4  ;;  %v191_v11 = vld [vmem:[%s788_s2 + $0x20] sm:$0xff]  ;;  %v192_v12 = vld [vmem:[%s788_s2 + $0x28] sm:$0xff]  ;;  %v20_v15 = vld [vmem:[%s787_s0 + $0x18] sm:$0xff] }
   0x5   :  { %114 = vmatprep.mubr.f32.mxu0 %v603_v2  ;;  %v672_v14 = vpack.c.bf16 %v192_v12, %v191_v11  ;;  %v21_v16 = vld [vmem:[%s787_s0 + $0x20] sm:$0xff]  ;;  %v22_v17 = vld [vmem:[%s787_s0 + $0x28] sm:$0xff]  ;;  %v193_v18 = vld [vmem:[%s788_s2 + $0x30] sm:$0xff]  ;;  %s604_s0 = smov 64  }
   0x6   :  { %572 = vmatprep.subr.bf16.mxu0 %v655_v9  ;;  %v194_v19 = vld [vmem:[%s788_s2 + $0x38] sm:$0xff]  ;;  %v195_v43 = vld [vmem:[%s789_s3] sm:$0xff]  ;;  %v196_v44 = vld [vmem:[%s789_s3 + $0x8] sm:$0xff] }
   0x7   :  { %574 = vmatpush3.bf16.msra.mxu0 %v655_v9  ;;  %v696_v20 = vpack.c.bf16 %v194_v19, %v193_v18  ;;  %v555_v45 = vpack.c.bf16 %v196_v44, %v195_v43  ;;  %v197_v46 = vld [vmem:[%s789_s3 + $0x10] sm:$0xff]  ;;  %v198_v47 = vld [vmem:[%s789_s3 + $0x18] sm:$0xff]  ;;  %v199_v49 = vld [vmem:[%s789_s3 + $0x20] sm:$0xff] }
   0x8   :  { %460 = vmatmul.mubr.msk.f32.gmra.mrb[2].mxu0 %vm25_vm0, %v18_v8  ;;  %576 = vmatprep.subr.bf16.mxu0 %v657_v10  ;;  %v559_v48 = vpack.c.bf16 %v198_v47, %v197_v46  ;;  %v200_v50 = vld [vmem:[%s789_s3 + $0x28] sm:$0xff]  ;;  %v201_v52 = vld [vmem:[%s789_s3 + $0x30] sm:$0xff]  ;;  %v202_v53 = vld [vmem:[%s789_s3 + $0x38] sm:$0xff] }
   0x9   :  { %120 = vmatprep.mubr.f32.mxu0 %v603_v2  ;;  %556 = vmatprep.subr.bf16.mxu1 %v555_v45  ;;  %v563_v51 = vpack.c.bf16 %v200_v50, %v199_v49  ;;  %v567_v54 = vpack.c.bf16 %v202_v53, %v201_v52 }
   0xa   :  { %558 = vmatpush3.bf16.msra.mxu1 %v555_v45 }
   0xb   :  { %578 = vmatpush3.bf16.msra.mxu0 %v657_v10  ;;  %560 = vmatprep.subr.bf16.mxu1 %v559_v48 }
   0xc   :  { %461 = vmatmul.mubr.msk.f32.gmra.mrb[4].mxu0 %vm25_vm0, %v19_v13  ;;  %580 = vmatprep.subr.bf16.mxu0 %v672_v14 }
   0xd   :  { %126 = vmatprep.mubr.f32.mxu0 %v603_v2 }
   0xe   :  { %562 = vmatpush3.bf16.msra.mxu1 %v559_v48 }
   0xf   :  { %582 = vmatpush3.bf16.msra.mxu0 %v672_v14  ;;  %564 = vmatprep.subr.bf16.mxu1 %v563_v51 }
  0x10   :  { %462 = vmatmul.mubr.msk.f32.gmra.mrb[6].mxu0 %vm25_vm0, %v20_v15  ;;  %584 = vmatprep.subr.bf16.mxu0 %v696_v20 }
  0x11   :  { %132 = vmatprep.mubr.f32.mxu0 %v603_v2 }
  0x12   :  { %566 = vmatpush3.bf16.msra.mxu1 %v563_v51 }
  0x13   :  { %586 = vmatpush3.bf16.msra.mxu0 %v696_v20  ;;  %568 = vmatprep.subr.bf16.mxu1 %v567_v54 }
  0x14   :  { %463 = vmatmul.mubr.msk.f32.gmra.mrb[8].mxu0 %vm25_vm0, %v21_v16 }
  0x15   :  { %138 = vmatprep.mubr.f32.mxu0 %v603_v2 }
  0x16   :  { %570 = vmatpush3.bf16.msra.mxu1 %v567_v54 }
  0x17   :  { %587 = vmatprep.subr.bf16.mxu1 %v655_v9 }
  0x18   :  { %464 = vmatmul.mubr.msk.f32.gmra.mrb[10].mxu0 %vm25_vm0, %v22_v17 }
  0xd7   :  { %v110_v21 = vpop.f32.mrb[0].mxu0 }
  0xd8   :  { %v145_v22 = vmax.f32 %v110_v21, 0.0  ;;  %v112_v23 = vpop.f32.mrb[1].mxu0 }
  0xd9   :  { %v151_v24 = vmax.f32 %v112_v23, 0.0 }
  0xda   :  { %546 = vmatprep.mubr.msk.f32.mxu0 %vm221_vm1, %v145_v22 }
  0xdb   :  { %163 = vrot.lane.b32.xlu0 %v151_v24, %s604_s0  ;;  %v116_v25 = vpop.f32.mrb[2].mxu0 }
  0xdc   :  { %v146_v26 = vmax.f32 %v116_v25, 0.0  ;;  %v118_v27 = vpop.f32.mrb[3].mxu0 }
  0xdd   :  { %v152_v28 = vmax.f32 %v118_v27, 0.0 }
  0xde   :  { %547 = vmatmul.mubr.msk.f32.vlgmr.msra.gmra.mrb[12].mxu0 %vm221_vm1, %v146_v26 }
  0xdf   :  { %165 = vrot.lane.b32.xlu0 %v152_v28, %s604_s0  ;;  %v122_v29 = vpop.f32.mrb[4].mxu0 }
  0xe0   :  { %v147_v30 = vmax.f32 %v122_v29, 0.0  ;;  %v124_v31 = vpop.f32.mrb[5].mxu0 }
  0xe1   :  { %v153_v32 = vmax.f32 %v124_v31, 0.0 }
  0xe2   :  { %549 = vmatprep.mubr.msk.f32.mxu0 %vm221_vm1, %v147_v30 }
  0xe3   :  { %167 = vrot.lane.b32.xlu1 %v153_v32, %s604_s0  ;;  %v128_v33 = vpop.f32.mrb[6].mxu0 }
  0xe4   :  { %v148_v34 = vmax.f32 %v128_v33, 0.0  ;;  %v130_v35 = vpop.f32.mrb[7].mxu0 }
  0xe5   :  { %v154_v36 = vmax.f32 %v130_v35, 0.0 }
  0xe6   :  { %550 = vmatmul.mubr.msk.f32.gmra.mrb[14].mxu0 %vm221_vm1, %v148_v34 }
  0xe7   :  { %169 = vrot.lane.b32.xlu1 %v154_v36, %s604_s0  ;;  %v708_v37 = vpop.f32.mrb[8].mxu0 }
  0xe8   :  { %v136_v38 = vpop.f32.mrb[9].mxu0  ;;  %v149_v63 = vmax.f32 %v708_v37, 0.0 }
  0xe9   :  { %v155_v39 = vmax.f32 %v136_v38, 0.0 }
  0xeb   :  { %171 = vrot.lane.b32.xlu0 %v155_v39, %s604_s0  ;;  %v711_v40 = vpop.f32.mrb[10].mxu0 }
  0xec   :  { %v142_v41 = vpop.f32.mrb[11].mxu0  ;;  %v150_v2 = vmax.f32 %v711_v40, 0.0 }
  0xed   :  { %v156_v42 = vmax.f32 %v142_v41, 0.0 }
  0xef   :  { %173 = vrot.lane.b32.xlu1 %v156_v42, %s604_s0 }
 0x14d   :  { %v164_v55 = vpop.permute.xlu0 %163 }
 0x14e   :  { %v181_v56 = vmul.f32 %v164_v55, %v145_v22 }
 0x150   :  { %209 = vrot.lane.b32.xlu0 %v181_v56, %s604_s0 }
 0x151   :  { %v166_v57 = vpop.permute.xlu0 %165 }
 0x152   :  { %v182_v58 = vmul.f32 %v166_v57, %v146_v26 }
 0x154   :  { %211 = vrot.lane.b32.xlu1 %v182_v58, %s604_s0 }
 0x155   :  { %v168_v59 = vpop.permute.xlu1 %167 }
 0x156   :  { %v183_v60 = vmul.f32 %v168_v59, %v147_v30 }
 0x158   :  { %213 = vrot.lane.b32.xlu0 %v183_v60, %s604_s0 }
 0x159   :  { %v170_v61 = vpop.permute.xlu1 %169 }
 0x15a   :  { %v184_v62 = vmul.f32 %v170_v61, %v148_v34 }
 0x15c   :  { %215 = vrot.lane.b32.xlu1 %v184_v62, %s604_s0 }
 0x15d   :  { %v172_v0 = vpop.permute.xlu0 %171 }
 0x15e   :  { %v185_v1 = vmul.f32 %v172_v0, %v149_v63 }
 0x160   :  { %217 = vrot.lane.b32.xlu0 %v185_v1, %s604_s0 }
 0x161   :  { %v174_v3 = vpop.permute.xlu1 %173 }
 0x162   :  { %v186_v4 = vmul.f32 %v174_v3, %v150_v2 }
 0x164   :  { %219 = vrot.lane.b32.xlu1 %v186_v4, %s604_s0 }
 0x1b1   :  { %v548_v5 = vpop.f32.mrb[12].mxu0 }
 0x1b2   :  { %v413_v6 = vpop.f32.mrb[13].mxu0 }
 0x1b9   :  { %v551_v7 = vpop.f32.mrb[14].mxu0 }
 0x1ba   :  { %v423_v8 = vpop.f32.mrb[15].mxu0 }
 0x1c2   :  { %v210_v11 = vpop.permute.xlu0 %209 }
 0x1c3   :  { %521 = vmatprep.mubr.msk.f32.mxu1 %vm221_vm1, %v210_v11 }
 0x1c6   :  { %v212_v12 = vpop.permute.xlu1 %211 }
 0x1c7   :  { %522 = vmatmul.mubr.msk.f32.vlgmr.msra.gmra.mrb[0].mxu1 %vm221_vm1, %v212_v12 }
 0x1c8   :  { %591 = vmatpush3.bf16.msra.mxu1 %v655_v9 }
 0x1c9   :  { %588 = vmatprep.subr.bf16.mxu1 %v657_v10 }
 0x1ca   :  { %v214_v13 = vpop.permute.xlu0 %213 }
 0x1cb   :  { %524 = vmatprep.mubr.msk.f32.mxu1 %vm221_vm1, %v214_v13 }
 0x1cc   :  { %592 = vmatpush3.bf16.msra.mxu1 %v657_v10 }
 0x1cd   :  { %589 = vmatprep.subr.bf16.mxu1 %v672_v14 }
 0x1ce   :  { %v216_v15 = vpop.permute.xlu1 %215 }
 0x1cf   :  { %525 = vmatmul.mubr.msk.f32.gmra.mrb[2].mxu1 %vm221_vm1, %v216_v15 }
 0x1d0   :  { %593 = vmatpush3.bf16.msra.mxu1 %v672_v14 }
 0x1d1   :  { %590 = vmatprep.subr.bf16.mxu1 %v696_v20 }
 0x1d2   :  { %v218_v16 = vpop.permute.xlu0 %217 }
 0x1d3   :  { %527 = vmatprep.mubr.msk.f32.mxu1 %vm221_vm1, %v218_v16 }
 0x1d4   :  { %594 = vmatpush3.bf16.msra.mxu1 %v696_v20 }
 0x1d6   :  { %v220_v9 = vpop.permute.xlu1 %219 }
 0x1d7   :  { %528 = vmatmul.mubr.msk.f32.gmra.mrb[4].mxu1 %vm221_vm1, %v220_v9 }
 0x1d8   :  { %552 = vmatprep.mubr.msk.f32.mxu1 %vm221_vm1, %v149_v63 }
 0x1df   :  { %553 = vmatmul.mubr.msk.f32.vlgmr.msra.gmra.mrb[4].mxu1 %vm221_vm1, %v150_v2 }
 0x29a   :  { %v523_v10 = vpop.f32.mrb[0].mxu1 }
 0x29b   :  { %v419_v17 = vadd.f32 %v548_v5, %v523_v10  ;;  %v300_v18 = vpop.f32.mrb[1].mxu1 }
 0x29c   :  { %v414_v19 = vadd.f32 %v413_v6, %v300_v18 }
 0x29d   :  { %v443_v14 = vmax.f32 %v419_v17, 0.0 }
 0x29e   :  { %v442_v21 = vmax.f32 %v414_v19, 0.0 }
 0x29f   :  { %450 = vst.msk [vmem:[%s790_s4 + $0x8] sm:$0xff] %vm448_vm2, %v443_v14 }
 0x2a0   :  { %449 = vst.msk [vmem:[%s790_s4] sm:$0xff] %vm448_vm2, %v442_v21 }
 0x2a2   :  { %v526_v20 = vpop.f32.mrb[2].mxu1 }
 0x2a3   :  { %v429_v22 = vadd.f32 %v551_v7, %v526_v20  ;;  %v310_v23 = vpop.f32.mrb[3].mxu1 }
 0x2a4   :  { %v424_v24 = vadd.f32 %v423_v8, %v310_v23 }
 0x2a5   :  { %v445_v25 = vmax.f32 %v429_v22, 0.0 }
 0x2a6   :  { %v444_v26 = vmax.f32 %v424_v24, 0.0 }
 0x2a7   :  { %452 = vst.msk [vmem:[%s790_s4 + $0x18] sm:$0xff] %vm448_vm2, %v445_v25 }
 0x2a8   :  { %451 = vst.msk [vmem:[%s790_s4 + $0x10] sm:$0xff] %vm448_vm2, %v444_v26 }
 0x2b2   :  { %v554_v27 = vpop.f32.mrb[4].mxu1 }
 0x2b3   :  { %v447_v28 = vmax.f32 %v554_v27, 0.0  ;;  %v433_v29 = vpop.f32.mrb[5].mxu1 }
 0x2b4   :  { %v446_v30 = vmax.f32 %v433_v29, 0.0 }
 0x2b5   :  { %454 = vst.msk [vmem:[%s790_s4 + $0x28] sm:$0xff] %vm448_vm2, %v447_v28 }
 0x2b6   :  { %453 = vst.msk [vmem:[%s790_s4 + $0x20] sm:$0xff] %vm448_vm2, %v446_v30 }

// kernel: gnnml3_forward.5
= control target key start
LH: loop header
LB: loop body
LE: loop exit
PB: predicated region body
PF: predicated region fallthrough
CT: control target
= control target key end

     0   :  { %v250_v0 = vmov 0.0|0.0   ;;  %vm251_vm0 = vmmov 0   ;;  %v252_v4 = vmov 0.0   ;;  %vm34_vm1 = vcmask 261120   ;;  %s319_s1 = inlined_call_operand.vmem [shape: f32[32,32], index: 1, kind: input, shape index: {}]   ;;  %s320_s3 = inlined_call_operand.vmem [shape: f32[32,1], index: 3, kind: input, shape index: {}]   ;;  %s321_s0 = inlined_call_operand.vmem [shape: f32[2,32], index: 0, kind: input, shape index: {}]   ;;  %s322_s4 = inlined_call_operand.<no memory space> [shape: f32[1,1], index: 4, kind: input, shape index: {}]   ;;  %s323_s2 = inlined_call_operand.vmem [shape: f32[1,32], index: 2, kind: input, shape index: {}]   ;;  %s324_s5 = inlined_call_operand.vmem [shape: f32[2,1], index: 5, kind: output, shape index: {}]  }
   0x1   :  { %235 = vmatprep.subr.bf16.mxu0 %v250_v0  ;;  %v23_v1 = vld [vmem:[%s319_s1] sm:$0xff]  ;;  %v24_v2 = vld [vmem:[%s319_s1 + $0x8] sm:$0xff]  ;;  %v25_v3 = vld [vmem:[%s319_s1 + $0x10] sm:$0xff]  ;;  %221 = vmatprep.mubr.msk.f32.mxu0 %vm251_vm0, %v252_v4  ;;  %v10_v15 = vstv %s322_s4  ;;  %vm193_vm2 = vcmask 1024  }
   0x2   :  { %v236_v5 = vpack.c.bf16 %v24_v2, %v23_v1  ;;  %v26_v6 = vld [vmem:[%s319_s1 + $0x18] sm:$0xff]  ;;  %241 = vmatprep.subr.bf16.mxu1 %v250_v0  ;;  %v109_v7 = vld [vmem:[%s320_s3] sm:$0xff]  ;;  %232 = vmatprep.mubr.msk.f32.mxu1 %vm251_vm0, %v252_v4  ;;  %v110_v8 = vld [vmem:[%s320_s3 + $0x8] sm:$0xff]  ;;  %11 = vst [vmem:[#allocation2] sm:$0x1] %v10_v15 }
   0x3   :  { %v239_v9 = vpack.c.bf16 %v26_v6, %v25_v3  ;;  %v242_v10 = vpack.c.bf16 %v110_v8, %v109_v7  ;;  %v22_v11 = vld [vmem:[%s321_s0] sm:$0x3]  ;;  %v111_v12 = vld [vmem:[%s320_s3 + $0x10] sm:$0xff]  ;;  %v112_v13 = vld [vmem:[%s320_s3 + $0x18] sm:$0xff] }
   0x4   :  { %237 = vmatpush3.bf16.msra.mxu0 %v236_v5  ;;  %v245_v14 = vpack.c.bf16 %v112_v13, %v111_v12  ;;  %v199_v16 = vld [vmem:[%s323_s2] ss:$0 sm:$0xff] }
   0x5   :  { %238 = vmatprep.subr.bf16.mxu0 %v250_v0  ;;  %243 = vmatpush3.bf16.msra.mxu1 %v242_v10 }
   0x6   :  { %244 = vmatprep.subr.bf16.mxu1 %v250_v0 }
   0x8   :  { %240 = vmatpush3.bf16.msra.mxu0 %v239_v9 }
   0x9   :  { %246 = vmatpush3.bf16.msra.mxu1 %v245_v14  ;;  %v201_v21 = vld [vmem:[#allocation2] ss:$0 sm:$0xff] }
   0xb   :  { %222 = vmatmul.mubr.msk.f32.vlgmr.msra.gmra.mrb[0].mxu0 %vm34_vm1, %v22_v11 }
  0xde   :  { %v104_v17 = vpop.f32.mrb[0].mxu0 }
  0xdf   :  { %v105_v18 = vadd.f32 %v199_v16, %v104_v17  ;;  %v223_v19 = vpop.f32.mrb[1].mxu0 }
  0xe1   :  { %v108_v20 = vmax.f32 %v105_v18, 0.0 }
  0xe3   :  { %233 = vmatmul.mubr.msk.f32.vlgmr.msra.gmra.mrb[0].mxu1 %vm34_vm1, %v108_v20 }
 0x1b6   :  { %v189_v22 = vpop.f32.mrb[0].mxu1 }
 0x1b7   :  { %v190_v23 = vadd.f32 %v201_v21, %v189_v22  ;;  %v234_v24 = vpop.f32.mrb[1].mxu1 }
 0x1b9   :  { %194 = vst.msk [vmem:[%s324_s5] sm:$0x3] %vm193_vm2, %v190_v23 }

// kernel: gnnml3_forward.4
= control target key start
LH: loop header
LB: loop body
LE: loop exit
PB: predicated region body
PF: predicated region fallthrough
CT: control target
= control target key end

     0   :  { %11 = vsyncpa [#allocation5], 0  ;;  %s2490_s0 = inlined_call_operand.vmem [shape: bf16[4,32,256], index: 0, kind: input, shape index: {}]   ;;  %s2491_s1 = inlined_call_operand.vmem [shape: f32[32,32], index: 1, kind: input, shape index: {}]   ;;  %s2492_s2 = inlined_call_operand.hbm [shape: f32[4,8,32,30], index: 2, kind: input, shape index: {}]   ;;  %s2493_s3 = inlined_call_operand.vmem [shape: f32[4,1,30], index: 3, kind: input, shape index: {}]   ;;  %s2494_s4 = inlined_call_operand.vmem [shape: f32[4,32,4], index: 4, kind: input, shape index: {}]   ;;  %s2495_s5 = inlined_call_operand.vmem [shape: f32[4,1,4], index: 5, kind: input, shape index: {}]   ;;  %s2496_s6 = inlined_call_operand.vmem [shape: f32[32,32], index: 6, kind: output, shape index: {}]  }
   0x1   :  { %13 = vsyncpa [#allocation5 + $0x1], 0  ;;  %s2143_s21 = smov 0   ;;  %s2145_s22 = smov 0  }
   0x2   :  { %s2147_s23 = smov 0   ;;  %s2149_s24 = smov 0  }
   0x3   :  { %s2151_s25 = smov 0   ;;  %s2153_s26 = smov 0  }
   0x4 LB: > { %s1559_s27 = sadd.s32 4294967295, %s2101_s26   ;;  %s31_s28 = sadd.s32 1, %s2097_s25  ;;  %s2101_s26 = sphi %s2153_s26, %s19_s26   ;;  %s2097_s25 = sphi %s2151_s25, %s2504_s25   ;;  %s2093_s24 = sphi %s2149_s24, %s2503_s24   ;;  %s2089_s23 = sphi %s2147_s23, %s2502_s23   ;;  %s2085_s22 = sphi %s2145_s22, %s2501_s22   ;;  %s2081_s21 = sphi %s2143_s21, %s2500_s21  }
   0x5   : > { %p33_p0 = scmp.ge.s32.totalorder %s31_s28, 4  ;;  %s87_s29 = sadd.s32 1, %s2089_s23 }
   0x6   : > { %p94_p1 = scmp.ne.s32.totalorder %s2089_s23, %s2085_s22  ;;  %p95_p2 = scmp.eq.s32.totalorder %s2101_s26, 0 }
   0x7   : > { %s2506_s28 = smov (%p33_p0, %s31_s28), 0  ;;  %p100_p4 = scmp.ne.s32.totalorder %s2085_s22, %s2081_s21 }
   0x8   : > { %p2179_p3 = por %p95_p2, %p94_p1  ;;  %s84_s7 = ssub.s32 %s2097_s25, %s2506_s28 }
   0x9   : > { %p101_p5 = scmp.eq.s32.totalorder %s1559_s27, 0  ;;  %p85_p6 = scmp.eq.s32.totalorder %s84_s7, 0 }
   0xa   : > { %p1954_p8 = scmp.lt.s32.totalorder %s2101_s26, 4  ;;  %s245_s10 = sand.u32 1, %s2089_s23  }
   0xb   : > { %p2186_p7 = por %p101_p5, %p100_p4  ;;  %s1646_s11 = sshll.u32 %s2097_s25, 12 }
   0xc   : > { %s2192_s9 = scalar_select %p85_p6, %s2089_s23, %s87_s29  }
   0xd   : > { %s1562_s12 = sshll.u32 %s245_s10, 8  ;;  %s2199_s15 = scalar_lea.hbm %s2492_s2, %s1646_s11 }
   0xe   : > { %s249_s16 = scalar_lea.vmem [#allocation4], %s1562_s12  ;;  %p2203_p9 = pnand %p1954_p8, %p2179_p3 }
   0xf   : > { %s256_s17 = sshll.u32 %s249_s16, 4  ;;  %s2209_s19 = scalar_lea.sflag [#allocation5], %s245_s10  ;;  %s2207_s17 = int_to_ptr.vmem [resolvable:$true] %s256_s17 }
  0x10   : > { %s2021_s20 = scalar_lea.hbm %s2199_s15, 4096  ;;  %p2023_p11 = pneg %p2203_p9 }
  0x11   : > { %p2022_p10 = scmp.ne.s32.totalorder %s2199_s15, %s2021_s20  ;;  %s2026_s29 = scalar_lea.hbm %s2492_s2, 16384 }
  0x12   : > { %p2027_p0 = scmp.lt.u32.totalorder %s2199_s15, %s2492_s2  ;;  %p2028_p1 = scmp.lt.u32.totalorder %s2026_s29, %s2021_s20 }
  0x13   : > { %p2024_p12 = pnand %p2023_p11, %p2022_p10  ;;  %p2030_p3 = scmp.lt.u32.totalorder %s2021_s20, %s2199_s15 }
  0x14   : > { %p2029_p2 = por %p2028_p1, %p2027_p0 }
  0x15   : > { %p2025_p13 = pneg %p2024_p12 }
  0x16   : > { %p2031_p4 = por %p2030_p3, %p2029_p2 }
  0x18   : > { %p2032_p5 = pnand %p2031_p4, %p2025_p13 }
  0x1a   : > { %2035 = shalt.err (!%p2032_p5)
}
  0x1b   : > { %s2036_s10 = scalar_lea.vmem %s2207_s17, 4096  ;;  %s2103_s11 = smov [#allocation4]  }
  0x1c   : > { %p2037_p6 = scmp.ne.s32.totalorder %s2207_s17, %s2036_s10  ;;  %s2041_s12 = sshll.u32 %s2103_s11, 4  ;;  %s2042_s12 = int_to_ptr.vmem [resolvable:$false] %s2041_s12 }
  0x1d   : > { %s2043_s13 = scalar_lea.vmem %s2042_s12, 8192  ;;  %p2044_p12 = scmp.lt.s32.totalorder %s2207_s17, %s2042_s12 }
  0x1e   : > { %p2039_p8 = pnand %p2037_p6, %p2023_p11  ;;  %p2045_p0 = scmp.lt.s32.totalorder %s2043_s13, %s2036_s10 }
  0x20   : > { %p2040_p10 = pneg %p2039_p8  ;;  %p2046_p1 = por %p2045_p0, %p2044_p12 }
  0x22   : > { %p2047_p2 = pnand %p2046_p1, %p2040_p10 }
  0x24   : > { %2050 = shalt.err (!%p2047_p2)
}
  0x25   : > { %s2104_s14 = smov 128   ;;  %s2105_s16 = smov 8  }
  0x26   : > { %1953 = dma.hbm_to_vmem [thread:$0]  (!%p2203_p9), %s2199_s15, 4096, %s2207_s17, %s2209_s19, %s2104_s14, %s2104_s14, %s2105_s16  }
  0x27   : > { %p1565_p11 = scmp.ge.s32.totalorder %s2101_s26, 1  ;;  %p284_p13 = scmp.lt.s32.totalorder %s2101_s26, 5 }
  0x29   : > { %p285_p3 = pnand %p1565_p11, %p284_p13 }
  0x2a   : > { %s290_s20 = sand.u32 (!%p285_p3), 1, %s2085_s22  }
  0x2b   : > { %288 = sbr.rel (%p285_p3) target bundleno = 594 (0x252), region = 44  ;;  %s1566_s21 = sshll.u32 (!%p285_p3), %s290_s20, 8 }
  0x2c   : > { %s291_s27 = scalar_lea.sflag (!%p285_p3), [#allocation5], %s290_s20  ;;  %s2240_s29 = scalar_lea.vmem (!%p285_p3), [#allocation4], %s1566_s21 }
  0x32   : > { %2076 = dma.done.wait (%p2186_p7), %s291_s27, 4096  }
  0x33   : > { %2078 = vsyncadd (%p2186_p7), %s291_s27, 4294963200  ;;  %p345_p9 = scmp.lt.s32.totalorder %s2093_s24, 3  ;;  %p373_p4 = scmp.eq.s32.totalorder %s2093_s24, 0 }
  0x34   : > { %v379_v0 = vld [vmem:[%s2491_s1] sm:$0xff] (%p373_p4)  ;;  %vm383_vm0 = vcmask (%p373_p4), 261120   ;;  %v380_v1 = vld [vmem:[%s2491_s1 + $0x8] sm:$0xff] (%p373_p4)  ;;  %v381_v2 = vld [vmem:[%s2491_s1 + $0x10] sm:$0xff] (%p373_p4) }
  0x35   : > { %s2508_s24 = smov (!%p345_p9, %s2093_s24), 3  ;;  %378 = sbr.rel (!%p373_p4) target bundleno = 60 (0x3c), region = 52 }
  0x36   : > { %s1647_s15 = sshll.u32 %s2508_s24, 5  ;;  %s357_s19 = scalar_lea.vmem %s2493_s3, %s2508_s24  ;;  %384 = vst.msk [vmem:[#allocation2] sm:$0xff] (%p373_p4), %vm383_vm0, %v379_v0  ;;  %385 = vst.msk [vmem:[#allocation2 + $0x8] sm:$0xff] (%p373_p4), %vm383_vm0, %v380_v1  ;;  %v382_v3 = vld [vmem:[%s2491_s1 + $0x18] sm:$0xff] (%p373_p4) }
  0x37   : > { %s2259_s8 = scalar_lea.vmem %s2490_s0, %s1647_s15  ;;  %s2264_s12 = scalar_lea.vmem %s2494_s4, %s1647_s15  ;;  %386 = vst.msk [vmem:[#allocation2 + $0x10] sm:$0xff] (%p373_p4), %vm383_vm0, %v381_v2  ;;  %387 = vst.msk [vmem:[#allocation2 + $0x18] sm:$0xff] (%p373_p4), %vm383_vm0, %v382_v3 }
  0x38   : > { %s365_s16 = scalar_lea.vmem %s2495_s5, %s2508_s24 }
  0x3c PF: > { %v395_v4 = vld [vmem:[%s2240_s29] sm:$0xff]  ;;  %v396_v5 = vld [vmem:[%s2240_s29 + $0x8] sm:$0xff]  ;;  %vm399_vm1 = vcmask 261120   ;;  %v397_v9 = vld [vmem:[%s2240_s29 + $0x10] sm:$0xff]  ;;  %vm499_vm2 = vcmask 244736   ;;  %s2106_s11 = smov 126  }
  0x3d   : > { %v1600_v6 = vld [vmem:[%s2240_s29 + $0x80] sm:$0xff]  ;;  %v1876_v7 = vpack.c.bf16 %v396_v5, %v395_v4  ;;  %v1601_v8 = vld [vmem:[%s2240_s29 + $0x88] sm:$0xff]  ;;  %v398_v10 = vld [vmem:[%s2240_s29 + $0x18] sm:$0xff]  ;;  %vm1420_vm3 = vcmask 261360  }
  0x3e   : > { %v1908_v11 = vpack.c.bf16 %v1601_v8, %v1600_v6  ;;  %v1880_v12 = vpack.c.bf16 %v398_v10, %v397_v9  ;;  %v1602_v13 = vld [vmem:[%s2240_s29 + $0x90] sm:$0xff]  ;;  %v1603_v14 = vld [vmem:[%s2240_s29 + $0x98] sm:$0xff]  ;;  %v2290_v15 = vld [vmem:[#allocation2] sm:$0xff] }
  0x3f   : > { %1877 = vmatprep.subr.bf16.mxu1 %v1876_v7  ;;  %v1912_v16 = vpack.c.bf16 %v1603_v14, %v1602_v13  ;;  %1758 = vmatprep.mubr.msk.f32.mxu1 %vm399_vm1, %v2290_v15  ;;  %v1576_v17 = vld [vmem:[%s2240_s29 + $0x20] sm:$0xff]  ;;  %v1577_v18 = vld [vmem:[%s2240_s29 + $0x28] sm:$0xff]  ;;  %v1578_v20 = vld [vmem:[%s2240_s29 + $0x30] sm:$0xff] }
  0x40   : > { %1909 = vmatprep.subr.bf16.mxu0 %v1908_v11  ;;  %1879 = vmatpush3.bf16.msra.mxu1 %v1876_v7  ;;  %v1884_v19 = vpack.c.bf16 %v1577_v18, %v1576_v17  ;;  %v1579_v21 = vld [vmem:[%s2240_s29 + $0x38] sm:$0xff]  ;;  %v2300_v22 = vld [vmem:[#allocation2 + $0x8] sm:$0xff]  ;;  %v1616_v23 = vld [vmem:[%s2240_s29 + $0xc0] sm:$0xff] }
  0x41   : > { %1911 = vmatpush3.bf16.msra.mxu0 %v1908_v11  ;;  %1881 = vmatprep.subr.bf16.mxu1 %v1880_v12  ;;  %v1617_v24 = vld [vmem:[%s2240_s29 + $0xc8] sm:$0xff]  ;;  %v2304_v25 = vld [vmem:[#allocation2 + $0x10] sm:$0xff]  ;;  %v1888_v26 = vpack.c.bf16 %v1579_v21, %v1578_v20  ;;  %v1584_v27 = vld [vmem:[%s2240_s29 + $0x40] sm:$0xff] }
  0x42   : > { %1913 = vmatprep.subr.bf16.mxu0 %v1912_v16  ;;  %1814 = vmatprep.mubr.msk.f32.mxu0 %vm399_vm1, %v2290_v15  ;;  %v1585_v28 = vld [vmem:[%s2240_s29 + $0x48] sm:$0xff]  ;;  %v1924_v29 = vpack.c.bf16 %v1617_v24, %v1616_v23  ;;  %v1618_v30 = vld [vmem:[%s2240_s29 + $0xd0] sm:$0xff]  ;;  %v1619_v31 = vld [vmem:[%s2240_s29 + $0xd8] sm:$0xff] }
  0x43   : > { %v2314_v32 = vld [vmem:[#allocation2 + $0x18] sm:$0xff]  ;;  %v1892_v33 = vpack.c.bf16 %v1585_v28, %v1584_v27  ;;  %v1586_v34 = vld [vmem:[%s2240_s29 + $0x50] sm:$0xff]  ;;  %v1928_v36 = vpack.c.bf16 %v1619_v31, %v1618_v30  ;;  %v1592_v38 = vld [vmem:[%s2240_s29 + $0x60] sm:$0xff] }
  0x44   : > { %1883 = vmatpush3.bf16.msra.mxu1 %v1880_v12  ;;  %v1587_v35 = vld [vmem:[%s2240_s29 + $0x58] sm:$0xff]  ;;  %v1593_v39 = vld [vmem:[%s2240_s29 + $0x68] sm:$0xff]  ;;  %v1594_v41 = vld [vmem:[%s2240_s29 + $0x70] sm:$0xff] }
  0x45   : > { %1915 = vmatpush3.bf16.msra.mxu0 %v1912_v16  ;;  %1885 = vmatprep.subr.bf16.mxu1 %v1884_v19  ;;  %v1896_v37 = vpack.c.bf16 %v1587_v35, %v1586_v34  ;;  %v1900_v40 = vpack.c.bf16 %v1593_v39, %v1592_v38  ;;  %v1595_v42 = vld [vmem:[%s2240_s29 + $0x78] sm:$0xff]  ;;  %v1608_v44 = vld [vmem:[%s2240_s29 + $0xa0] sm:$0xff]  ;;  %v1609_v45 = vld [vmem:[%s2240_s29 + $0xa8] sm:$0xff] }
  0x46   : > { %1925 = vmatprep.subr.bf16.mxu0 %v1924_v29  ;;  %v1904_v43 = vpack.c.bf16 %v1595_v42, %v1594_v41  ;;  %v1916_v46 = vpack.c.bf16 %v1609_v45, %v1608_v44  ;;  %v1610_v47 = vld [vmem:[%s2240_s29 + $0xb0] sm:$0xff]  ;;  %v1611_v48 = vld [vmem:[%s2240_s29 + $0xb8] sm:$0xff]  ;;  %v1624_v50 = vld [vmem:[%s2240_s29 + $0xe0] sm:$0xff] }
  0x47   : > { %1759 = vmatmul.mubr.msk.f32.vlgmr.msra.gmra.mrb[0].mxu1 %vm399_vm1, %v2300_v22  ;;  %v1920_v49 = vpack.c.bf16 %v1611_v48, %v1610_v47  ;;  %v1625_v51 = vld [vmem:[%s2240_s29 + $0xe8] sm:$0xff]  ;;  %v1626_v53 = vld [vmem:[%s2240_s29 + $0xf0] sm:$0xff]  ;;  %v1627_v54 = vld [vmem:[%s2240_s29 + $0xf8] sm:$0xff] }
  0x48   : > { %1815 = vmatmul.mubr.msk.f32.vlgmr.msra.gmra.mrb[0].mxu0 %vm399_vm1, %v2300_v22  ;;  %1887 = vmatpush3.bf16.msra.mxu1 %v1884_v19  ;;  %v1932_v52 = vpack.c.bf16 %v1625_v51, %v1624_v50  ;;  %v1936_v55 = vpack.c.bf16 %v1627_v54, %v1626_v53  ;;  %v1266_v56 = vld [vmem:[%s2264_s12] sm:$0xff]  ;;  %v1267_v57 = vld [vmem:[%s2264_s12 + $0x8] sm:$0xff]  ;;  %v1268_v59 = vld [vmem:[%s2264_s12 + $0x10] sm:$0xff] }
  0x49   : > { %1761 = vmatprep.mubr.msk.f32.mxu1 %vm399_vm1, %v2304_v25  ;;  %1817 = vmatprep.mubr.msk.f32.mxu0 %vm399_vm1, %v2304_v25  ;;  %v1940_v58 = vpack.c.bf16 %v1267_v57, %v1266_v56  ;;  %v1269_v60 = vld [vmem:[%s2264_s12 + $0x18] sm:$0xff]  ;;  %v2009_v62 = vld [vmem:[%s2259_s8 + $0x4] ss:$8 sps:$4 sm:$0xff]   ;;  %v1637_v54 = vld [vmem:[%s365_s16] ss:$0 sm:$0xff]  ;;  %s2107_s12 = smov 30  }
  0x4a   : > { %1889 = vmatprep.subr.bf16.mxu1 %v1888_v26  ;;  %1927 = vmatpush3.bf16.msra.mxu0 %v1924_v29  ;;  %v1944_v61 = vpack.c.bf16 %v1269_v60, %v1268_v59 }
  0x4b   : > { %1762 = vmatmul.mubr.msk.f32.gmra.mrb[2].mxu1 %vm399_vm1, %v2314_v32  ;;  %1929 = vmatprep.subr.bf16.mxu0 %v1928_v36 }
  0x4c   : > { %1818 = vmatmul.mubr.msk.f32.gmra.mrb[2].mxu0 %vm399_vm1, %v2314_v32  ;;  %1891 = vmatpush3.bf16.msra.mxu1 %v1888_v26 }
  0x4d   : > { %1772 = vmatprep.mubr.msk.f32.mxu1 %vm399_vm1, %v2290_v15  ;;  %1893 = vmatprep.subr.bf16.mxu1 %v1892_v33 }
  0x4e   : > { %1842 = vmatprep.mubr.msk.f32.mxu0 %vm399_vm1, %v2290_v15  ;;  %1931 = vmatpush3.bf16.msra.mxu0 %v1928_v36 }
  0x4f   : > { %1773 = vmatmul.mubr.msk.f32.vlgmr.msra.gmra.mrb[4].mxu1 %vm399_vm1, %v2300_v22 }
  0x50   : > { %1895 = vmatpush3.bf16.msra.mxu1 %v1892_v33  ;;  %1775 = vmatprep.mubr.msk.f32.mxu1 %vm399_vm1, %v2304_v25 }
  0x51   : > { %1897 = vmatprep.subr.bf16.mxu1 %v1896_v37  ;;  %1843 = vmatmul.mubr.msk.f32.vlgmr.msra.gmra.mrb[4].mxu0 %vm399_vm1, %v2300_v22 }
  0x52   : > { %1845 = vmatprep.mubr.msk.f32.mxu0 %vm399_vm1, %v2304_v25 }
  0x53   : > { %1776 = vmatmul.mubr.msk.f32.gmra.mrb[6].mxu1 %vm399_vm1, %v2314_v32 }
  0x54   : > { %1899 = vmatpush3.bf16.msra.mxu1 %v1896_v37  ;;  %1786 = vmatprep.mubr.msk.f32.mxu1 %vm399_vm1, %v2290_v15 }
  0x55   : > { %1901 = vmatprep.subr.bf16.mxu1 %v1900_v40  ;;  %1846 = vmatmul.mubr.msk.f32.gmra.mrb[6].mxu0 %vm399_vm1, %v2314_v32 }
  0x56   : > { %1245 = vmatprep.mubr.bf16.mxu0 %v2009_v62 }
  0x57   : > { %1787 = vmatmul.mubr.msk.f32.vlgmr.msra.gmra.mrb[8].mxu1 %vm399_vm1, %v2300_v22 }
  0x58   : > { %1903 = vmatpush3.bf16.msra.mxu1 %v1900_v40  ;;  %1789 = vmatprep.mubr.msk.f32.mxu1 %vm399_vm1, %v2304_v25 }
  0x59   : > { %1905 = vmatprep.subr.bf16.mxu1 %v1904_v43 }
  0x5b   : > { %1790 = vmatmul.mubr.msk.f32.gmra.mrb[10].mxu1 %vm399_vm1, %v2314_v32 }
  0x5c   : > { %1907 = vmatpush3.bf16.msra.mxu1 %v1904_v43  ;;  %1800 = vmatprep.mubr.msk.f32.mxu1 %vm399_vm1, %v2290_v15 }
  0x5d   : > { %1917 = vmatprep.subr.bf16.mxu1 %v1916_v46 }
  0x5f   : > { %1801 = vmatmul.mubr.msk.f32.vlgmr.msra.gmra.mrb[12].mxu1 %vm399_vm1, %v2300_v22 }
  0x60   : > { %1919 = vmatpush3.bf16.msra.mxu1 %v1916_v46  ;;  %1803 = vmatprep.mubr.msk.f32.mxu1 %vm399_vm1, %v2304_v25 }
  0x61   : > { %1921 = vmatprep.subr.bf16.mxu1 %v1920_v49 }
  0x63   : > { %1804 = vmatmul.mubr.msk.f32.gmra.mrb[14].mxu1 %vm399_vm1, %v2314_v32 }
  0x64   : > { %1923 = vmatpush3.bf16.msra.mxu1 %v1920_v49  ;;  %1828 = vmatprep.mubr.msk.f32.mxu1 %vm399_vm1, %v2290_v15 }
  0x65   : > { %1933 = vmatprep.subr.bf16.mxu1 %v1932_v52 }
  0x67   : > { %1829 = vmatmul.mubr.msk.f32.vlgmr.msra.gmra.mrb[16].mxu1 %vm399_vm1, %v2300_v22 }
  0x68   : > { %1935 = vmatpush3.bf16.msra.mxu1 %v1932_v52  ;;  %1831 = vmatprep.mubr.msk.f32.mxu1 %vm399_vm1, %v2304_v25 }
  0x69   : > { %1937 = vmatprep.subr.bf16.mxu1 %v1936_v55 }
  0x6b   : > { %1832 = vmatmul.mubr.msk.f32.gmra.mrb[18].mxu1 %vm399_vm1, %v2314_v32 }
  0x6c   : > { %1939 = vmatpush3.bf16.msra.mxu1 %v1936_v55  ;;  %1856 = vmatprep.mubr.msk.f32.mxu1 %vm399_vm1, %v2290_v15 }
  0x6d   : > { %1941 = vmatprep.subr.bf16.mxu1 %v1940_v58 }
  0x6f   : > { %1857 = vmatmul.mubr.msk.f32.vlgmr.msra.gmra.mrb[20].mxu1 %vm399_vm1, %v2300_v22 }
  0x70   : > { %1943 = vmatpush3.bf16.msra.mxu1 %v1940_v58  ;;  %1859 = vmatprep.mubr.msk.f32.mxu1 %vm399_vm1, %v2304_v25 }
  0x71   : > { %1945 = vmatprep.subr.bf16.mxu1 %v1944_v61 }
  0x73   : > { %1860 = vmatmul.mubr.msk.f32.gmra.mrb[22].mxu1 %vm399_vm1, %v2314_v32 }
  0x74   : > { %1947 = vmatpush3.bf16.msra.mxu1 %v1944_v61  ;;  %1870 = vmatprep.mubr.msk.f32.mxu1 %vm399_vm1, %v2290_v15 }
  0x77   : > { %1871 = vmatmul.mubr.msk.f32.vlgmr.msra.gmra.mrb[24].mxu1 %vm399_vm1, %v2300_v22 }
  0x78   : > { %1873 = vmatprep.mubr.msk.f32.mxu1 %vm399_vm1, %v2304_v25 }
  0x7b   : > { %1874 = vmatmul.mubr.msk.f32.gmra.mrb[26].mxu1 %vm399_vm1, %v2314_v32 }
 0x11a   : > { %v1760_v63 = vpop.f32.mrb[0].mxu1 }
 0x11b   : > { %v1816_v0 = vpop.f32.mrb[0].mxu0  ;;  %v478_v1 = vpop.f32.mrb[1].mxu1 }
 0x11c   : > { %v497_v2 = vpack.c.bf16 %v1760_v63, %v478_v1  ;;  %v855_v3 = vpop.f32.mrb[1].mxu0 }
 0x11d   : > { %v874_v4 = vpack.c.bf16 %v1816_v0, %v855_v3 }
 0x11e   : > { %500 = vst.msk [vmem:[#allocation3] sm:$0xff] %vm499_vm2, %v497_v2  ;;  %v1763_v5 = vpop.f32.mrb[2].mxu1 }
 0x11f   : > { %876 = vst.msk [vmem:[#allocation3 + $0x40] sm:$0xff] %vm499_vm2, %v874_v4  ;;  %v1819_v6 = vpop.f32.mrb[2].mxu0  ;;  %v488_v7 = vpop.f32.mrb[3].mxu1 }
 0x120   : > { %v498_v8 = vpack.c.bf16 %v1763_v5, %v488_v7  ;;  %v865_v9 = vpop.f32.mrb[3].mxu0 }
 0x121   : > { %v875_v10 = vpack.c.bf16 %v1819_v6, %v865_v9  ;;  %v2007_v9 = vld [vmem:[%s2259_s8] ss:$8 sps:$4 sm:$0xff]  }
 0x122   : > { %501 = vst.msk [vmem:[#allocation3 + $0x8] sm:$0xff] %vm499_vm2, %v498_v8  ;;  %v1774_v11 = vpop.f32.mrb[4].mxu1 }
 0x123   : > { %877 = vst.msk [vmem:[#allocation3 + $0x48] sm:$0xff] %vm499_vm2, %v875_v10  ;;  %v573_v12 = vpop.f32.mrb[5].mxu1 }
 0x124   : > { %v592_v13 = vpack.c.bf16 %v1774_v11, %v573_v12  ;;  %v1844_v15 = vpop.f32.mrb[4].mxu0  ;;  %v2010_v11 = vld [vmem:[%s2259_s8 + $0x14] ss:$8 sps:$4 sm:$0xff]  }
 0x125   : > { %v1170_v14 = vld [vmem:[#allocation3] sm:$0xff]  ;;  %v1043_v18 = vpop.f32.mrb[5].mxu0 }
 0x126   : > { %594 = vst.msk [vmem:[#allocation3 + $0x10] sm:$0xff] %vm499_vm2, %v592_v13  ;;  %v1777_v16 = vpop.f32.mrb[6].mxu1  ;;  %v1178_v17 = vld [vmem:[#allocation3 + $0x40] sm:$0xff]  ;;  %v1062_v20 = vpack.c.bf16 %v1844_v15, %v1043_v18 }
 0x127   : > { %1714 = vmatprep.subr.bf16.mxu0 %v1178_v17  ;;  %v583_v19 = vpop.f32.mrb[7].mxu1 }
 0x128   : > { %v593_v21 = vpack.c.bf16 %v1777_v16, %v583_v19  ;;  %1715 = vmatpush3.bf16.msra.mxu0 %v1170_v14  ;;  %1064 = vst.msk [vmem:[#allocation3 + $0x60] sm:$0xff] %vm499_vm2, %v1062_v20  ;;  %v1847_v23 = vpop.f32.mrb[6].mxu0  ;;  %v2012_v14 = vld [vmem:[%s2259_s8 + $0x10] ss:$8 sps:$4 sm:$0xff]  }
 0x129   : > { %v1171_v22 = vld [vmem:[#allocation3 + $0x8] sm:$0xff]  ;;  %v1053_v26 = vpop.f32.mrb[7].mxu0 }
 0x12a   : > { %595 = vst.msk [vmem:[#allocation3 + $0x18] sm:$0xff] %vm499_vm2, %v593_v21  ;;  %v1788_v24 = vpop.f32.mrb[8].mxu1  ;;  %v1179_v25 = vld [vmem:[#allocation3 + $0x48] sm:$0xff]  ;;  %v1063_v28 = vpack.c.bf16 %v1847_v23, %v1053_v26 }
 0x12b   : > { %1716 = vmatprep.subr.bf16.mxu0 %v1179_v25  ;;  %v667_v27 = vpop.f32.mrb[9].mxu1 }
 0x12c   : > { %v686_v29 = vpack.c.bf16 %v1788_v24, %v667_v27  ;;  %1717 = vmatpush3.bf16.msra.mxu0 %v1171_v22  ;;  %1065 = vst.msk [vmem:[#allocation3 + $0x68] sm:$0xff] %vm499_vm2, %v1063_v28  ;;  %v1632_v24 = vld [vmem:[%s357_s19] ss:$0 sm:$0xff] }
 0x12d   : > { %v1172_v50 = vld [vmem:[#allocation3 + $0x10] sm:$0xff] }
 0x12e   : > { %688 = vst.msk [vmem:[#allocation3 + $0x20] sm:$0xff] %vm499_vm2, %v686_v29  ;;  %v1791_v30 = vpop.f32.mrb[10].mxu1 }
 0x12f   : > { %v677_v31 = vpop.f32.mrb[11].mxu1  ;;  %v1182_v55 = vld [vmem:[#allocation3 + $0x60] sm:$0xff] }
 0x130   : > { %v687_v32 = vpack.c.bf16 %v1791_v30, %v677_v31 }
 0x131   : > { %v1173_v57 = vld [vmem:[#allocation3 + $0x18] sm:$0xff] }
 0x132   : > { %689 = vst.msk [vmem:[#allocation3 + $0x28] sm:$0xff] %vm499_vm2, %v687_v32  ;;  %v1802_v33 = vpop.f32.mrb[12].mxu1 }
 0x133   : > { %v761_v34 = vpop.f32.mrb[13].mxu1  ;;  %v1183_v61 = vld [vmem:[#allocation3 + $0x68] sm:$0xff] }
 0x134   : > { %v780_v35 = vpack.c.bf16 %v1802_v33, %v761_v34 }
 0x135   : > { %v1174_v63 = vld [vmem:[#allocation3 + $0x20] sm:$0xff] }
 0x136   : > { %782 = vst.msk [vmem:[#allocation3 + $0x30] sm:$0xff] %vm499_vm2, %v780_v35  ;;  %v1805_v36 = vpop.f32.mrb[14].mxu1 }
 0x137   : > { %v771_v37 = vpop.f32.mrb[15].mxu1 }
 0x138   : > { %v781_v38 = vpack.c.bf16 %v1805_v36, %v771_v37 }
 0x139   : > { %v1175_v3 = vld [vmem:[#allocation3 + $0x28] sm:$0xff] }
 0x13a   : > { %783 = vst.msk [vmem:[#allocation3 + $0x38] sm:$0xff] %vm499_vm2, %v781_v38  ;;  %v1830_v39 = vpop.f32.mrb[16].mxu1 }
 0x13b   : > { %v949_v40 = vpop.f32.mrb[17].mxu1 }
 0x13c   : > { %v968_v41 = vpack.c.bf16 %v1830_v39, %v949_v40 }
 0x13d   : > { %v1176_v5 = vld [vmem:[#allocation3 + $0x30] sm:$0xff] }
 0x13e   : > { %970 = vst.msk [vmem:[#allocation3 + $0x50] sm:$0xff] %vm499_vm2, %v968_v41  ;;  %v1833_v42 = vpop.f32.mrb[18].mxu1 }
 0x13f   : > { %v959_v43 = vpop.f32.mrb[19].mxu1 }
 0x140   : > { %v969_v44 = vpack.c.bf16 %v1833_v42, %v959_v43 }
 0x141   : > { %v1177_v8 = vld [vmem:[#allocation3 + $0x38] sm:$0xff] }
 0x142   : > { %971 = vst.msk [vmem:[#allocation3 + $0x58] sm:$0xff] %vm499_vm2, %v969_v44  ;;  %v1858_v45 = vpop.f32.mrb[20].mxu1 }
 0x143   : > { %v1137_v46 = vpop.f32.mrb[21].mxu1 }
 0x144   : > { %v1156_v47 = vpack.c.bf16 %v1858_v45, %v1137_v46 }
 0x145   : > { %v1180_v48 = vld [vmem:[#allocation3 + $0x50] sm:$0xff] }
 0x146   : > { %1158 = vst.msk [vmem:[#allocation3 + $0x70] sm:$0xff] %vm499_vm2, %v1156_v47  ;;  %v1861_v49 = vpop.f32.mrb[22].mxu1  ;;  %1718 = vmatprep.subr.bf16.mxu0 %v1180_v48 }
 0x147   : > { %v1147_v51 = vpop.f32.mrb[23].mxu1  ;;  %1719 = vmatpush3.bf16.msra.mxu0 %v1172_v50 }
 0x148   : > { %v1157_v52 = vpack.c.bf16 %v1861_v49, %v1147_v51 }
 0x149   : > { %v1181_v53 = vld [vmem:[#allocation3 + $0x58] sm:$0xff] }
 0x14a   : > { %1159 = vst.msk [vmem:[#allocation3 + $0x78] sm:$0xff] %vm499_vm2, %v1157_v52  ;;  %1720 = vmatprep.subr.bf16.mxu0 %v1181_v53  ;;  %v1872_v56 = vpop.f32.mrb[24].mxu1 }
 0x14b   : > { %1721 = vmatpush3.bf16.msra.mxu0 %v1173_v57  ;;  %v1356_v58 = vpop.f32.mrb[25].mxu1  ;;  %v1362_v60 = vadd.f32 %v1872_v56, %v1637_v54 }
 0x14c   : > { %v1357_v59 = vadd.f32 %v1637_v54, %v1356_v58  ;;  %1722 = vmatprep.subr.bf16.mxu0 %v1182_v55 }
 0x14d   : > { %v1184_v4 = vld [vmem:[#allocation3 + $0x70] sm:$0xff] }
 0x14e   : > { %2013 = vtanh.f32 %v1357_v59  ;;  %v1875_v62 = vpop.f32.mrb[26].mxu1 }
 0x14f   : > { %1723 = vmatpush3.bf16.msra.mxu0 %v1174_v63  ;;  %v1366_v0 = vpop.f32.mrb[27].mxu1  ;;  %2015 = vtanh.f32 %v1362_v60  ;;  %v1372_v2 = vadd.f32 %v1875_v62, %v1637_v54 }
 0x150   : > { %v1367_v1 = vadd.f32 %v1637_v54, %v1366_v0  ;;  %1724 = vmatprep.subr.bf16.mxu0 %v1183_v61 }
 0x151   : > { %v1185_v6 = vld [vmem:[#allocation3 + $0x78] sm:$0xff] }
 0x152   : > { %2017 = vtanh.f32 %v1367_v1 }
 0x153   : > { %1725 = vmatpush3.bf16.msra.mxu0 %v1175_v3  ;;  %2019 = vtanh.f32 %v1372_v2 }
 0x154   : > { %1726 = vmatprep.subr.bf16.mxu0 %v1184_v4 }
 0x157   : > { %1727 = vmatpush3.bf16.msra.mxu0 %v1176_v5 }
 0x158   : > { %v2014_v7 = vpop.eup %2013  ;;  %1728 = vmatprep.subr.bf16.mxu0 %v1185_v6 }
 0x159   : > { %1383 = vrot.lane.b32.xlu0 %v2014_v7, %s2106_s11  ;;  %v2016_v10 = vpop.eup %2015 }
 0x15b   : > { %1729 = vmatpush3.bf16.msra.mxu0 %v1177_v8 }
 0x15c   : > { %v2018_v12 = vpop.eup %2017 }
 0x15d   : > { %1387 = vrot.lane.b32.xlu1 %v2018_v12, %s2106_s11  ;;  %1385 = vrot.lane.b32.xlu0 %v2016_v10, %s2106_s11  ;;  %v2020_v13 = vpop.eup %2019 }
 0x15e   : > { %1246 = vmatmul.mubr.bf16.vlgmr.msra.gmra.mrb[8].mxu0 %v2007_v9 }
 0x15f   : > { %1253 = vmatprep.mubr.bf16.mxu0 %v2010_v11 }
 0x161   : > { %1389 = vrot.lane.b32.xlu1 %v2020_v13, %s2106_s11 }
 0x166   : > { %1254 = vmatmul.mubr.bf16.gmra.mrb[12].mxu0 %v2012_v14 }
 0x1cb   : > { %v1384_v15 = vpop.permute.xlu0 %1383 }
 0x1cc   : > { %v1395_v16 = vmul.f32 %v2014_v7, %v1384_v15 }
 0x1ce   : > { %1408 = vrot.lane.b32.xlu0 %v1395_v16, %s2107_s12 }
 0x1cf   : > { %v1388_v17 = vpop.permute.xlu1 %1387  ;;  %v1386_v18 = vpop.permute.xlu0 %1385 }
 0x1d0   : > { %v1397_v19 = vmul.f32 %v2018_v12, %v1388_v17  ;;  %v1396_v20 = vmul.f32 %v2016_v10, %v1386_v18 }
 0x1d2   : > { %1412 = vrot.lane.b32.xlu0 %v1397_v19, %s2107_s12  ;;  %1410 = vrot.lane.b32.xlu1 %v1396_v20, %s2107_s12 }
 0x1d3   : > { %v1390_v21 = vpop.permute.xlu1 %1389 }
 0x1d4   : > { %v1398_v22 = vmul.f32 %v2020_v13, %v1390_v21 }
 0x1d6   : > { %1414 = vrot.lane.b32.xlu1 %v1398_v22, %s2107_s12 }
 0x231   : > { %v1730_v23 = vpop.f32.mrb[8].mxu0 }
 0x232   : > { %v1731_v25 = vpop.f32.mrb[9].mxu0 }
 0x233   : > { %v1732_v26 = vadd.f32 %v1731_v25, %v1730_v23  ;;  %v1733_v27 = vpop.f32.mrb[10].mxu0 }
 0x234   : > { %v1734_v28 = vpop.f32.mrb[11].mxu0 }
 0x235   : > { %v1248_v29 = vadd.f32 %v1732_v26, %v1632_v24  ;;  %v1735_v30 = vadd.f32 %v1734_v28, %v1733_v27 }
 0x237   : > { %v1262_v31 = vmax.f32 %v1248_v29, 0.0  ;;  %v1251_v32 = vadd.f32 %v1735_v30, %v1632_v24 }
 0x239   : > { %1400 = vst.msk [vmem:[%s2496_s6] sm:$0xff] %vm499_vm2, %v1262_v31  ;;  %v1263_v33 = vmax.f32 %v1251_v32, 0.0  ;;  %v1736_v34 = vpop.f32.mrb[12].mxu0 }
 0x23a   : > { %v1737_v35 = vpop.f32.mrb[13].mxu0 }
 0x23b   : > { %1401 = vst.msk [vmem:[%s2496_s6 + $0x8] sm:$0xff] %vm499_vm2, %v1263_v33  ;;  %v1738_v36 = vadd.f32 %v1737_v35, %v1736_v34  ;;  %v1739_v37 = vpop.f32.mrb[14].mxu0 }
 0x23c   : > { %v1740_v38 = vpop.f32.mrb[15].mxu0 }
 0x23d   : > { %v1256_v39 = vadd.f32 %v1738_v36, %v1632_v24  ;;  %v1741_v40 = vadd.f32 %v1740_v38, %v1739_v37 }
 0x23f   : > { %v1264_v41 = vmax.f32 %v1256_v39, 0.0  ;;  %v1259_v42 = vadd.f32 %v1741_v40, %v1632_v24 }
 0x240   : > { %v1409_v43 = vpop.permute.xlu0 %1408 }
 0x241   : > { %1402 = vst.msk [vmem:[%s2496_s6 + $0x10] sm:$0xff] %vm499_vm2, %v1264_v41  ;;  %v1265_v44 = vmax.f32 %v1259_v42, 0.0 }
 0x242   : > { %1421 = vst.msk [vmem:[%s2496_s6] sm:$0xff] %vm1420_vm3, %v1409_v43 }
 0x243   : > { %1403 = vst.msk [vmem:[%s2496_s6 + $0x18] sm:$0xff] %vm499_vm2, %v1265_v44 }
 0x244   : > { %v1411_v45 = vpop.permute.xlu1 %1410  ;;  %v1413_v46 = vpop.permute.xlu0 %1412 }
 0x245   : > { %1422 = vst.msk [vmem:[%s2496_s6 + $0x8] sm:$0xff] %vm1420_vm3, %v1411_v45  ;;  %1423 = vst.msk [vmem:[%s2496_s6 + $0x10] sm:$0xff] %vm1420_vm3, %v1413_v46 }
 0x248   : > { %v1415_v48 = vpop.permute.xlu1 %1414 }
 0x249   : > { %v1425_v47 = vld [vmem:[%s2496_s6] sm:$0xff]  ;;  %1424 = vst.msk [vmem:[%s2496_s6 + $0x18] sm:$0xff] %vm1420_vm3, %v1415_v48 }
 0x24a   : > { %1429 = vst.msk [vmem:[#allocation2] sm:$0xff] %vm399_vm1, %v1425_v47 }
 0x24c   : > { %v1426_v49 = vld [vmem:[%s2496_s6 + $0x8] sm:$0xff]  ;;  %v1427_v50 = vld [vmem:[%s2496_s6 + $0x10] sm:$0xff] }
 0x24d   : > { %1430 = vst.msk [vmem:[#allocation2 + $0x8] sm:$0xff] %vm399_vm1, %v1426_v49  ;;  %1431 = vst.msk [vmem:[#allocation2 + $0x10] sm:$0xff] %vm399_vm1, %v1427_v50 }
 0x250   : > { %v1428_v51 = vld [vmem:[%s2496_s6 + $0x18] sm:$0xff] }
 0x251   : > { %1432 = vst.msk [vmem:[#allocation2 + $0x18] sm:$0xff] %vm399_vm1, %v1428_v51 }
 0x252 PF: > { %s19_s26 = sadd.s32 1, %s2101_s26   ;;  %s2500_s21 = smov %s2085_s22 }
 0x253   : > { %p16_p7 = scmp.ge.s32.totalorder %s19_s26, 6   ;;  %s2501_s22 = smov %s2089_s23 }
 0x254   : > { %s2502_s23 = smov %s2192_s9  ;;  %s2503_s24 = smov %s2097_s25 }
 0x255   : > { %s2504_s25 = smov %s2506_s28  ;;  %18 = sbr.rel (!%p16_p7) target bundleno = 4 (0x4), region = 112 }
 0x25c   :  { %1455 = vsyncpa [#allocation5], 1 }
 0x25d   :  { %1457 = vsyncpa [#allocation5 + $0x1], 1 }

</bundles_post_ra>
